<compile_context>
chip_gen: v5e
topology: v5e:2x2
jax: 0.10.0
libtpu: 0.0.40
codegen_flags: <defaults>
</compile_context>

<pallas_src>
import functools

import jax
import jax.numpy as jnp
from jax import lax
from jax.experimental import pallas as pl
from jax.experimental.pallas import tpu as pltpu

PRECS = 1e-05
LANE = 128

# 0 BETA, 1 FC, 2 K0, 3 K1, 4 K2, 5 LP, 6 PERC, 7 UZL, 8 TT, 9 CFMAX,
# 10 CFR, 11 CWH, 12 BETAET, 13 C
HBV_SCALE = [
    [1, 6], [50, 1000], [0.05, 0.9], [0.01, 0.5], [0.001, 0.2], [0.2, 1],
    [0, 10], [0, 100], [-2.5, 2.5], [0.5, 10], [0, 0.1], [0, 0.2], [0.3, 5], [0, 1],
]


def _round_up(x, m):
    return (x + m - 1) // m * m


def _hbv_step(P, T, E, par, aux, state):
    """One HBV timestep; all tiles are (MU, G) (forcing broadcasts from (1, G))."""
    (parBETA, parFC, parK0, parK1, parK2, parLP, parPERC, parUZL, parTT,
     parCFMAX, parCFR, parCWH, parBETAET, parC) = par
    inv_FC, inv_LPFC, CFRxCFMAX = aux
    SNOWPACK, MELTWATER, SM, SUZ, SLZ = state

    RAIN = P * (T >= parTT).astype(jnp.float32)
    SNOW = P * (T < parTT).astype(jnp.float32)
    SNOWPACK = SNOWPACK + SNOW
    melt = jnp.maximum(parCFMAX * (T - parTT), 0.0)
    melt = jnp.minimum(melt, SNOWPACK)
    MELTWATER = MELTWATER + melt
    SNOWPACK = SNOWPACK - melt
    refreezing = jnp.maximum(CFRxCFMAX * (parTT - T), 0.0)
    refreezing = jnp.minimum(refreezing, MELTWATER)
    SNOWPACK = SNOWPACK + refreezing
    MELTWATER = MELTWATER - refreezing
    tosoil = jnp.maximum(MELTWATER - parCWH * SNOWPACK, 0.0)
    MELTWATER = MELTWATER - tosoil

    soil_wetness = jnp.clip((SM * inv_FC) ** parBETA, 0.0, 1.0)
    recharge = (RAIN + tosoil) * soil_wetness
    SM = SM + RAIN + tosoil - recharge
    excess = jnp.maximum(SM - parFC, 0.0)
    SM = SM - excess
    evapfactor = jnp.clip((SM * inv_LPFC) ** parBETAET, 0.0, 1.0)
    ETact = E * evapfactor
    ETact = jnp.minimum(SM, ETact)
    SM = jnp.maximum(SM - ETact, PRECS)
    capillary = jnp.minimum(SLZ, parC * SLZ * (1.0 - jnp.minimum(SM * inv_FC, 1.0)))
    SM = jnp.maximum(SM + capillary, PRECS)
    SLZ = jnp.maximum(SLZ - capillary, PRECS)

    SUZ = SUZ + recharge + excess
    PERC = jnp.minimum(SUZ, parPERC)
    SUZ = SUZ - PERC
    Q0 = parK0 * jnp.maximum(SUZ - parUZL, 0.0)
    SUZ = SUZ - Q0
    Q1 = parK1 * SUZ
    SUZ = SUZ - Q1
    SLZ = SLZ + PERC
    Q2 = parK2 * SLZ
    SLZ = SLZ - Q2

    return (SNOWPACK, MELTWATER, SM, SUZ, SLZ), (Q0, Q1, Q2, ETact)


def _hbv_kernel(x_ref, pstat_ref, pdyn_ref, out_ref,
                snow_ref, meltw_ref, sm_ref, suz_ref, slz_ref,
                *, tb, dyn_slot, inv_mu):
    # x_ref:     (TB, 3, GT)      forcing [P, T, ETpot] for this time block / G tile
    # pstat_ref: (14, MU, GT)     raw static parameters in [0,1] (resident across time)
    # pdyn_ref:  (TB, ND, MU, GT) raw dynamic (time-varying) parameters in [0,1]
    # out_ref:   (TB, 5, GT)      [Qsim, Q0, Q1, Q2, ETact] mu-means, lane-dense
    # scratch:   five (MU, GT) f32 state tiles, carried across time blocks per G tile

    # grid = (G_tiles, T_blocks): re-initialize the state at the first time block
    # of every G tile (time is program_id(1)).
    @pl.when(pl.program_id(1) == 0)
    def _():
        for ref in (snow_ref, meltw_ref, sm_ref, suz_ref, slz_ref):
            ref[...] = jnp.full(ref.shape, 0.001, jnp.float32)

    # Scale the static (time-invariant) parameters once per grid step.
    par_static = {}
    for ip in range(14):
        if ip not in dyn_slot:
            lo, hi = HBV_SCALE[ip]
            par_static[ip] = lo + pstat_ref[ip] * (hi - lo)

    fc_dyn = 1 in dyn_slot
    lp_dyn = 5 in dyn_slot
    cfmax_dyn = 9 in dyn_slot
    cfr_dyn = 10 in dyn_slot

    # Hoist per-tile invariants out of the time loop when their inputs are static.
    inv_fc_h = None if fc_dyn else 1.0 / par_static[1]
    inv_lpfc_h = None if (fc_dyn or lp_dyn) else 1.0 / (par_static[5] * par_static[1])
    cfrmax_h = None if (cfmax_dyn or cfr_dyn) else par_static[10] * par_static[9]

    state0 = (snow_ref[...], meltw_ref[...], sm_ref[...], suz_ref[...], slz_ref[...])

    def body(t, state):
        xt = x_ref[t]                       # (3, GT)
        P = xt[0:1]                         # (1, GT) broadcasts over MU (sublanes)
        T = xt[1:2]
        E = xt[2:3]

        if dyn_slot:
            pdyn_t = pdyn_ref[t]            # (ND, MU, GT)

        par = []
        for ip in range(14):
            if ip in dyn_slot:
                lo, hi = HBV_SCALE[ip]
                par.append(lo + pdyn_t[dyn_slot[ip]] * (hi - lo))
            else:
                par.append(par_static[ip])

        inv_fc = inv_fc_h if inv_fc_h is not None else 1.0 / par[1]
        inv_lpfc = inv_lpfc_h if inv_lpfc_h is not None else 1.0 / (par[5] * par[1])
        cfrmax = cfrmax_h if cfrmax_h is not None else par[10] * par[9]

        new_state, (Q0, Q1, Q2, ETact) = _hbv_step(
            P, T, E, par, (inv_fc, inv_lpfc, cfrmax), state)

        Qsim = Q0 + Q1 + Q2
        # Lane-dense (5, GT) row slab; mu-mean as sublane-sum * (1/mu).
        out_ref[t] = jnp.concatenate(
            [jnp.sum(Qsim, axis=0, keepdims=True) * inv_mu,
             jnp.sum(Q0, axis=0, keepdims=True) * inv_mu,
             jnp.sum(Q1, axis=0, keepdims=True) * inv_mu,
             jnp.sum(Q2, axis=0, keepdims=True) * inv_mu,
             jnp.sum(ETact, axis=0, keepdims=True) * inv_mu],
            axis=0)
        return new_state

    SNOWPACK, MELTWATER, SM, SUZ, SLZ = lax.fori_loop(0, tb, body, state0)

    snow_ref[...] = SNOWPACK
    meltw_ref[...] = MELTWATER
    sm_ref[...] = SM
    suz_ref[...] = SUZ
    slz_ref[...] = SLZ


@functools.partial(jax.jit,
                   static_argnames=("staind", "tdlst", "mu", "dydrop", "tb", "gt"))
def hbv_forward(x, parameters, staind, tdlst, mu, dydrop=0.0, tb=32, gt=256):
    """x: (T, G, 3) f32 [P, T, ETpot]; parameters: (T, G, 14, mu) f32 in [0,1].
    Returns Qall: (T, G, 5) = [Qsim, Q0, Q1, Q2, ETact] averaged over mu components.
    dydrop is handled deterministically (drmask == 0), matching the eval config."""
    Nstep, Ngrid, _ = x.shape

    dyn_idx = tuple(ix - 1 for ix in tdlst)            # 0-based dynamic param indices
    dyn_slot = {ip: j for j, ip in enumerate(dyn_idx)}
    nd = max(len(dyn_idx), 1)

    TB = min(tb, Nstep)
    t_pad = _round_up(Nstep, TB)
    GT = min(gt, _round_up(Ngrid, LANE))
    g_pad = _round_up(Ngrid, GT)

    # Forcing: (T, G, 3) -> (t_pad, 3, g_pad), G on the lane axis.
    x_t = jnp.transpose(x, (0, 2, 1))
    x_t = jnp.pad(x_t, ((0, t_pad - Nstep), (0, 0), (0, g_pad - Ngrid)))

    # Static raw params (at staind): (G, 14, MU) -> (14, MU, g_pad), passed once per G tile.
    pstat = jnp.transpose(parameters[staind], (1, 2, 0))
    pstat = jnp.pad(pstat, ((0, 0), (0, 0), (0, g_pad - Ngrid)), constant_values=0.5)

    # Dynamic raw params (only the tdlst subset): (T, G, ND, MU) -> (t_pad, ND, MU, g_pad).
    if dyn_idx:
        pdyn = jnp.stack([parameters[:, :, i, :] for i in dyn_idx], axis=2)
    else:
        pdyn = parameters[:, :, 0:1, :]                # dummy, never read in-kernel
    pdyn = jnp.transpose(pdyn, (0, 2, 3, 1))
    pdyn = jnp.pad(pdyn, ((0, t_pad - Nstep), (0, 0), (0, 0), (0, g_pad - Ngrid)),
                   constant_values=0.5)

    kernel = functools.partial(_hbv_kernel, tb=TB, dyn_slot=dyn_slot,
                               inv_mu=1.0 / float(mu))

    grid_spec = pltpu.PrefetchScalarGridSpec(
        num_scalar_prefetch=0,
        grid=(g_pad // GT, t_pad // TB),               # (G tiles, time blocks)
        in_specs=[
            pl.BlockSpec((TB, 3, GT), lambda g, t: (t, 0, g)),
            pl.BlockSpec((14, mu, GT), lambda g, t: (0, 0, g)),       # time-invariant
            pl.BlockSpec((TB, nd, mu, GT), lambda g, t: (t, 0, 0, g)),
        ],
        out_specs=pl.BlockSpec((TB, 5, GT), lambda g, t: (t, 0, g)),
        scratch_shapes=[pltpu.VMEM((mu, GT), jnp.float32)] * 5,
    )

    out = pl.pallas_call(
        kernel,
        out_shape=jax.ShapeDtypeStruct((t_pad, 5, g_pad), jnp.float32),
        grid_spec=grid_spec,
        compiler_params=pltpu.CompilerParams(
            dimension_semantics=("parallel", "arbitrary")),
    )(x_t, pstat, pdyn)

    # (t_pad, 5, g_pad) -> (T, G, 5) to match the PyTorch module's Qall layout.
    return jnp.transpose(out[:Nstep, :, :Ngrid], (0, 2, 1))


def hbv_reference(x, parameters, staind, tdlst, mu, dydrop=0.0):
    """Pure-JAX reference (lax.scan over time) mirroring the PyTorch forward verbatim."""
    sca = jnp.asarray(HBV_SCALE, dtype=jnp.float32)
    lo = sca[:, 0][None, None, :, None]
    hi = sca[:, 1][None, None, :, None]
    parAllTrans = lo + parameters * (hi - lo)                       # (T, G, 14, MU)
    parsta = parAllTrans[staind]
    parhbv = jnp.broadcast_to(parsta[None], parAllTrans.shape)
    if len(tdlst) > 0:
        dyn = jnp.zeros((14,), bool).at[jnp.asarray([i - 1 for i in tdlst])].set(True)
        parhbv = jnp.where(dyn[None, None, :, None], parAllTrans, parhbv)

    Nstep, Ngrid, _ = x.shape
    init = tuple(jnp.full((Ngrid, mu), 0.001, jnp.float32) for _ in range(5))

    def step(state, inp):
        xt, part = inp
        P = xt[:, 0:1]
        T = xt[:, 1:2]
        E = xt[:, 2:3]
        (parBETA, parFC, parK0, parK1, parK2, parLP, parPERC, parUZL, parTT,
         parCFMAX, parCFR, parCWH, parBETAET, parC) = [part[:, i, :] for i in range(14)]
        SNOWPACK, MELTWATER, SM, SUZ, SLZ = state

        RAIN = P * (T >= parTT).astype(jnp.float32)
        SNOW = P * (T < parTT).astype(jnp.float32)
        SNOWPACK = SNOWPACK + SNOW
        melt = jnp.minimum(jnp.maximum(parCFMAX * (T - parTT), 0.0), SNOWPACK)
        MELTWATER = MELTWATER + melt
        SNOWPACK = SNOWPACK - melt
        refreezing = jnp.minimum(
            jnp.maximum(parCFR * parCFMAX * (parTT - T), 0.0), MELTWATER)
        SNOWPACK = SNOWPACK + refreezing
        MELTWATER = MELTWATER - refreezing
        tosoil = jnp.maximum(MELTWATER - parCWH * SNOWPACK, 0.0)
        MELTWATER = MELTWATER - tosoil
        soil_wetness = jnp.clip((SM / parFC) ** parBETA, 0.0, 1.0)
        recharge = (RAIN + tosoil) * soil_wetness
        SM = SM + RAIN + tosoil - recharge
        excess = jnp.maximum(SM - parFC, 0.0)
        SM = SM - excess
        evapfactor = jnp.clip((SM / (parLP * parFC)) ** parBETAET, 0.0, 1.0)
        ETact = jnp.minimum(SM, E * evapfactor)
        SM = jnp.maximum(SM - ETact, PRECS)
        capillary = jnp.minimum(SLZ, parC * SLZ * (1.0 - jnp.minimum(SM / parFC, 1.0)))
        SM = jnp.maximum(SM + capillary, PRECS)
        SLZ = jnp.maximum(SLZ - capillary, PRECS)
        SUZ = SUZ + recharge + excess
        PERC = jnp.minimum(SUZ, parPERC)
        SUZ = SUZ - PERC
        Q0 = parK0 * jnp.maximum(SUZ - parUZL, 0.0)
        SUZ = SUZ - Q0
        Q1 = parK1 * SUZ
        SUZ = SUZ - Q1
        SLZ = SLZ + PERC
        Q2 = parK2 * SLZ
        SLZ = SLZ - Q2
        Qsim = Q0 + Q1 + Q2
        out = jnp.stack([Qsim.mean(-1), Q0.mean(-1), Q1.mean(-1),
                         Q2.mean(-1), ETact.mean(-1)], axis=-1)
        return (SNOWPACK, MELTWATER, SM, SUZ, SLZ), out

    _, outs = lax.scan(step, init, (x, parhbv))
    return outs


if __name__ == "__main__":
    Nstep, Ngrid, MU = 64, 100, 16   # Ngrid not a multiple of 128 -> exercises G padding
    key = jax.random.PRNGKey(0)
    kx, kp = jax.random.split(key)

    u = jax.random.uniform(kx, (Nstep, Ngrid, 3), dtype=jnp.float32)
    # physically plausible forcing: precip [0,20] mm, temp [-5,15] C, PET [0,5] mm
    x = jnp.stack([u[..., 0] * 20.0, u[..., 1] * 20.0 - 5.0, u[..., 2] * 5.0], axis=-1)
    parameters = jax.random.uniform(kp, (Nstep, Ngrid, 14, MU), dtype=jnp.float32)

    staind = 0
    tdlst = (1, 13)   # dynamic (time-varying) parameters: BETA, BETAET (1-based)

    qall = jax.block_until_ready(
        hbv_forward(x, parameters, staind, tdlst, MU, dydrop=0.0, tb=32, gt=256))
    qref = jax.block_until_ready(hbv_reference(x, parameters, staind, tdlst, MU))

    assert qall.shape == (Nstep, Ngrid, 5)
    err = float(jnp.max(jnp.abs(qall - qref)))
    assert jnp.allclose(qall, qref, rtol=1e-2, atol=1e-3), f"max abs diff {err}"
    print("KERNEL_OK")
</pallas_src>

<mosaic_0001>
module attributes {stable_mosaic.version = 11 : i64} {
  func.func @_hbv_kernel(%arg0: i32, %arg1: i32, %arg2: memref<32x3x128xf32, #tpu.memory_space<vmem>>, %arg3: memref<14x16x128xf32, #tpu.memory_space<vmem>>, %arg4: memref<32x2x16x128xf32, #tpu.memory_space<vmem>>, %arg5: memref<32x5x128xf32, #tpu.memory_space<vmem>>, %arg6: memref<16x128xf32, #tpu.memory_space<vmem>>, %arg7: memref<16x128xf32, #tpu.memory_space<vmem>>, %arg8: memref<16x128xf32, #tpu.memory_space<vmem>>, %arg9: memref<16x128xf32, #tpu.memory_space<vmem>>, %arg10: memref<16x128xf32, #tpu.memory_space<vmem>>) attributes {dimension_semantics = [#tpu.dimension_semantics<parallel>, #tpu.dimension_semantics<arbitrary>], iteration_bounds = array<i64: 1, 2>, scalar_prefetch = 0 : i64, scratch_operands = 5 : i64, tpu.core_type = #tpu.core_type<tc>, window_params = [{transform_indices = @transform_0, window_bounds = array<i64: 32, 3, 128>}, {transform_indices = @transform_1, window_bounds = array<i64: 14, 16, 128>}, {transform_indices = @transform_2, window_bounds = array<i64: 32, 2, 16, 128>}, {transform_indices = @transform_3, window_bounds = array<i64: 32, 5, 128>}]} {
    %c0_i32 = arith.constant 0 : i32
    %0 = arith.cmpi eq, %arg1, %c0_i32 : i32
    %1 = arith.extui %0 : i1 to i32
    %c0_i32_0 = arith.constant 0 : i32
    %2 = arith.cmpi ne, %1, %c0_i32_0 : i32
    scf.if %2 {
      %cst_71 = arith.constant 1.000000e-03 : f32
      %93 = vector.broadcast %cst_71 : f32 to vector<16x128xf32>
      %c0_72 = arith.constant 0 : index
      %c0_73 = arith.constant 0 : index
      %94 = vector.load %arg6[%c0_72, %c0_73] : memref<16x128xf32, #tpu.memory_space<vmem>>, vector<16x128xf32>
      tpu.vector_store %arg6[%c0_72, %c0_73], %93 {strides = array<i32>} : memref<16x128xf32, #tpu.memory_space<vmem>>, vector<16x128xf32>,
      %cst_74 = arith.constant 1.000000e-03 : f32
      %95 = vector.broadcast %cst_74 : f32 to vector<16x128xf32>
      %c0_75 = arith.constant 0 : index
      %c0_76 = arith.constant 0 : index
      %96 = vector.load %arg7[%c0_75, %c0_76] : memref<16x128xf32, #tpu.memory_space<vmem>>, vector<16x128xf32>
      tpu.vector_store %arg7[%c0_75, %c0_76], %95 {strides = array<i32>} : memref<16x128xf32, #tpu.memory_space<vmem>>, vector<16x128xf32>,
      %cst_77 = arith.constant 1.000000e-03 : f32
      %97 = vector.broadcast %cst_77 : f32 to vector<16x128xf32>
      %c0_78 = arith.constant 0 : index
      %c0_79 = arith.constant 0 : index
      %98 = vector.load %arg8[%c0_78, %c0_79] : memref<16x128xf32, #tpu.memory_space<vmem>>, vector<16x128xf32>
      tpu.vector_store %arg8[%c0_78, %c0_79], %97 {strides = array<i32>} : memref<16x128xf32, #tpu.memory_space<vmem>>, vector<16x128xf32>,
      %cst_80 = arith.constant 1.000000e-03 : f32
      %99 = vector.broadcast %cst_80 : f32 to vector<16x128xf32>
      %c0_81 = arith.constant 0 : index
      %c0_82 = arith.constant 0 : index
      %100 = vector.load %arg9[%c0_81, %c0_82] : memref<16x128xf32, #tpu.memory_space<vmem>>, vector<16x128xf32>
      tpu.vector_store %arg9[%c0_81, %c0_82], %99 {strides = array<i32>} : memref<16x128xf32, #tpu.memory_space<vmem>>, vector<16x128xf32>,
      %cst_83 = arith.constant 1.000000e-03 : f32
      %101 = vector.broadcast %cst_83 : f32 to vector<16x128xf32>
      %c0_84 = arith.constant 0 : index
      %c0_85 = arith.constant 0 : index
      %102 = vector.load %arg10[%c0_84, %c0_85] : memref<16x128xf32, #tpu.memory_space<vmem>>, vector<16x128xf32>
      tpu.vector_store %arg10[%c0_84, %c0_85], %101 {strides = array<i32>} : memref<16x128xf32, #tpu.memory_space<vmem>>, vector<16x128xf32>,
    } else {
    }
    %c1 = arith.constant 1 : index
    %c0 = arith.constant 0 : index
    %c0_1 = arith.constant 0 : index
    %3 = vector.load %arg3[%c1, %c0, %c0_1] : memref<14x16x128xf32, #tpu.memory_space<vmem>>, vector<1x16x128xf32>
    %4 = vector.shape_cast %3 : vector<1x16x128xf32> to vector<16x128xf32>
    %cst = arith.constant 9.500000e+02 : f32
    %5 = vector.broadcast %cst : f32 to vector<16x128xf32>
    %6 = arith.mulf %4, %5 : vector<16x128xf32>
    %cst_2 = arith.constant 5.000000e+01 : f32
    %7 = vector.broadcast %cst_2 : f32 to vector<16x128xf32>
    %8 = arith.addf %7, %6 : vector<16x128xf32>
    %c2 = arith.constant 2 : index
    %c0_3 = arith.constant 0 : index
    %c0_4 = arith.constant 0 : index
    %9 = vector.load %arg3[%c2, %c0_3, %c0_4] : memref<14x16x128xf32, #tpu.memory_space<vmem>>, vector<1x16x128xf32>
    %10 = vector.shape_cast %9 : vector<1x16x128xf32> to vector<16x128xf32>
    %cst_5 = arith.constant 8.500000e-01 : f32
    %11 = vector.broadcast %cst_5 : f32 to vector<16x128xf32>
    %12 = arith.mulf %10, %11 : vector<16x128xf32>
    %cst_6 = arith.constant 5.000000e-02 : f32
    %13 = vector.broadcast %cst_6 : f32 to vector<16x128xf32>
    %14 = arith.addf %13, %12 : vector<16x128xf32>
    %c3 = arith.constant 3 : index
    %c0_7 = arith.constant 0 : index
    %c0_8 = arith.constant 0 : index
    %15 = vector.load %arg3[%c3, %c0_7, %c0_8] : memref<14x16x128xf32, #tpu.memory_space<vmem>>, vector<1x16x128xf32>
    %16 = vector.shape_cast %15 : vector<1x16x128xf32> to vector<16x128xf32>
    %cst_9 = arith.constant 4.900000e-01 : f32
    %17 = vector.broadcast %cst_9 : f32 to vector<16x128xf32>
    %18 = arith.mulf %16, %17 : vector<16x128xf32>
    %cst_10 = arith.constant 0.00999999977 : f32
    %19 = vector.broadcast %cst_10 : f32 to vector<16x128xf32>
    %20 = arith.addf %19, %18 : vector<16x128xf32>
    %c4 = arith.constant 4 : index
    %c0_11 = arith.constant 0 : index
    %c0_12 = arith.constant 0 : index
    %21 = vector.load %arg3[%c4, %c0_11, %c0_12] : memref<14x16x128xf32, #tpu.memory_space<vmem>>, vector<1x16x128xf32>
    %22 = vector.shape_cast %21 : vector<1x16x128xf32> to vector<16x128xf32>
    %cst_13 = arith.constant 1.990000e-01 : f32
    %23 = vector.broadcast %cst_13 : f32 to vector<16x128xf32>
    %24 = arith.mulf %22, %23 : vector<16x128xf32>
    %cst_14 = arith.constant 1.000000e-03 : f32
    %25 = vector.broadcast %cst_14 : f32 to vector<16x128xf32>
    %26 = arith.addf %25, %24 : vector<16x128xf32>
    %c5 = arith.constant 5 : index
    %c0_15 = arith.constant 0 : index
    %c0_16 = arith.constant 0 : index
    %27 = vector.load %arg3[%c5, %c0_15, %c0_16] : memref<14x16x128xf32, #tpu.memory_space<vmem>>, vector<1x16x128xf32>
    %28 = vector.shape_cast %27 : vector<1x16x128xf32> to vector<16x128xf32>
    %cst_17 = arith.constant 8.000000e-01 : f32
    %29 = vector.broadcast %cst_17 : f32 to vector<16x128xf32>
    %30 = arith.mulf %28, %29 : vector<16x128xf32>
    %cst_18 = arith.constant 2.000000e-01 : f32
    %31 = vector.broadcast %cst_18 : f32 to vector<16x128xf32>
    %32 = arith.addf %31, %30 : vector<16x128xf32>
    %c6 = arith.constant 6 : index
    %c0_19 = arith.constant 0 : index
    %c0_20 = arith.constant 0 : index
    %33 = vector.load %arg3[%c6, %c0_19, %c0_20] : memref<14x16x128xf32, #tpu.memory_space<vmem>>, vector<1x16x128xf32>
    %34 = vector.shape_cast %33 : vector<1x16x128xf32> to vector<16x128xf32>
    %cst_21 = arith.constant 1.000000e+01 : f32
    %35 = vector.broadcast %cst_21 : f32 to vector<16x128xf32>
    %36 = arith.mulf %34, %35 : vector<16x128xf32>
    %cst_22 = arith.constant 0.000000e+00 : f32
    %37 = vector.broadcast %cst_22 : f32 to vector<16x128xf32>
    %38 = arith.addf %37, %36 : vector<16x128xf32>
    %c7 = arith.constant 7 : index
    %c0_23 = arith.constant 0 : index
    %c0_24 = arith.constant 0 : index
    %39 = vector.load %arg3[%c7, %c0_23, %c0_24] : memref<14x16x128xf32, #tpu.memory_space<vmem>>, vector<1x16x128xf32>
    %40 = vector.shape_cast %39 : vector<1x16x128xf32> to vector<16x128xf32>
    %cst_25 = arith.constant 1.000000e+02 : f32
    %41 = vector.broadcast %cst_25 : f32 to vector<16x128xf32>
    %42 = arith.mulf %40, %41 : vector<16x128xf32>
    %cst_26 = arith.constant 0.000000e+00 : f32
    %43 = vector.broadcast %cst_26 : f32 to vector<16x128xf32>
    %44 = arith.addf %43, %42 : vector<16x128xf32>
    %c8 = arith.constant 8 : index
    %c0_27 = arith.constant 0 : index
    %c0_28 = arith.constant 0 : index
    %45 = vector.load %arg3[%c8, %c0_27, %c0_28] : memref<14x16x128xf32, #tpu.memory_space<vmem>>, vector<1x16x128xf32>
    %46 = vector.shape_cast %45 : vector<1x16x128xf32> to vector<16x128xf32>
    %cst_29 = arith.constant 5.000000e+00 : f32
    %47 = vector.broadcast %cst_29 : f32 to vector<16x128xf32>
    %48 = arith.mulf %46, %47 : vector<16x128xf32>
    %cst_30 = arith.constant -2.500000e+00 : f32
    %49 = vector.broadcast %cst_30 : f32 to vector<16x128xf32>
    %50 = arith.addf %49, %48 : vector<16x128xf32>
    %c9 = arith.constant 9 : index
    %c0_31 = arith.constant 0 : index
    %c0_32 = arith.constant 0 : index
    %51 = vector.load %arg3[%c9, %c0_31, %c0_32] : memref<14x16x128xf32, #tpu.memory_space<vmem>>, vector<1x16x128xf32>
    %52 = vector.shape_cast %51 : vector<1x16x128xf32> to vector<16x128xf32>
    %cst_33 = arith.constant 9.500000e+00 : f32
    %53 = vector.broadcast %cst_33 : f32 to vector<16x128xf32>
    %54 = arith.mulf %52, %53 : vector<16x128xf32>
    %cst_34 = arith.constant 5.000000e-01 : f32
    %55 = vector.broadcast %cst_34 : f32 to vector<16x128xf32>
    %56 = arith.addf %55, %54 : vector<16x128xf32>
    %c10 = arith.constant 10 : index
    %c0_35 = arith.constant 0 : index
    %c0_36 = arith.constant 0 : index
    %57 = vector.load %arg3[%c10, %c0_35, %c0_36] : memref<14x16x128xf32, #tpu.memory_space<vmem>>, vector<1x16x128xf32>
    %58 = vector.shape_cast %57 : vector<1x16x128xf32> to vector<16x128xf32>
    %cst_37 = arith.constant 1.000000e-01 : f32
    %59 = vector.broadcast %cst_37 : f32 to vector<16x128xf32>
    %60 = arith.mulf %58, %59 : vector<16x128xf32>
    %cst_38 = arith.constant 0.000000e+00 : f32
    %61 = vector.broadcast %cst_38 : f32 to vector<16x128xf32>
    %62 = arith.addf %61, %60 : vector<16x128xf32>
    %c11 = arith.constant 11 : index
    %c0_39 = arith.constant 0 : index
    %c0_40 = arith.constant 0 : index
    %63 = vector.load %arg3[%c11, %c0_39, %c0_40] : memref<14x16x128xf32, #tpu.memory_space<vmem>>, vector<1x16x128xf32>
    %64 = vector.shape_cast %63 : vector<1x16x128xf32> to vector<16x128xf32>
    %cst_41 = arith.constant 2.000000e-01 : f32
    %65 = vector.broadcast %cst_41 : f32 to vector<16x128xf32>
    %66 = arith.mulf %64, %65 : vector<16x128xf32>
    %cst_42 = arith.constant 0.000000e+00 : f32
    %67 = vector.broadcast %cst_42 : f32 to vector<16x128xf32>
    %68 = arith.addf %67, %66 : vector<16x128xf32>
    %c13 = arith.constant 13 : index
    %c0_43 = arith.constant 0 : index
    %c0_44 = arith.constant 0 : index
    %69 = vector.load %arg3[%c13, %c0_43, %c0_44] : memref<14x16x128xf32, #tpu.memory_space<vmem>>, vector<1x16x128xf32>
    %70 = vector.shape_cast %69 : vector<1x16x128xf32> to vector<16x128xf32>
    %cst_45 = arith.constant 1.000000e+00 : f32
    %71 = vector.broadcast %cst_45 : f32 to vector<16x128xf32>
    %72 = arith.mulf %70, %71 : vector<16x128xf32>
    %cst_46 = arith.constant 0.000000e+00 : f32
    %73 = vector.broadcast %cst_46 : f32 to vector<16x128xf32>
    %74 = arith.addf %73, %72 : vector<16x128xf32>
    %cst_47 = arith.constant 1.000000e+00 : f32
    %75 = vector.broadcast %cst_47 : f32 to vector<16x128xf32>
    %76 = arith.divf %75, %8 : vector<16x128xf32>
    %77 = arith.mulf %32, %8 : vector<16x128xf32>
    %cst_48 = arith.constant 1.000000e+00 : f32
    %78 = vector.broadcast %cst_48 : f32 to vector<16x128xf32>
    %79 = arith.divf %78, %77 : vector<16x128xf32>
    %80 = arith.mulf %62, %56 : vector<16x128xf32>
    %c0_49 = arith.constant 0 : index
    %c0_50 = arith.constant 0 : index
    %81 = vector.load %arg6[%c0_49, %c0_50] : memref<16x128xf32, #tpu.memory_space<vmem>>, vector<16x128xf32>
    %c0_51 = arith.constant 0 : index
    %c0_52 = arith.constant 0 : index
    %82 = vector.load %arg7[%c0_51, %c0_52] : memref<16x128xf32, #tpu.memory_space<vmem>>, vector<16x128xf32>
    %c0_53 = arith.constant 0 : index
    %c0_54 = arith.constant 0 : index
    %83 = vector.load %arg8[%c0_53, %c0_54] : memref<16x128xf32, #tpu.memory_space<vmem>>, vector<16x128xf32>
    %c0_55 = arith.constant 0 : index
    %c0_56 = arith.constant 0 : index
    %84 = vector.load %arg9[%c0_55, %c0_56] : memref<16x128xf32, #tpu.memory_space<vmem>>, vector<16x128xf32>
    %c0_57 = arith.constant 0 : index
    %c0_58 = arith.constant 0 : index
    %85 = vector.load %arg10[%c0_57, %c0_58] : memref<16x128xf32, #tpu.memory_space<vmem>>, vector<16x128xf32>
    %c0_i32_59 = arith.constant 0 : i32
    %c32_i32 = arith.constant 32 : i32
    %86 = arith.addi %c0_i32_59, %c32_i32 : i32
    %c1_i32 = arith.constant 1 : i32
    %87:5 = scf.for %arg11 = %c0_i32_59 to %86 step %c1_i32 iter_args(%arg12 = %81, %arg13 = %82, %arg14 = %83, %arg15 = %84, %arg16 = %85) -> (vector<16x128xf32>, vector<16x128xf32>, vector<16x128xf32>, vector<16x128xf32>, vector<16x128xf32>)  : i32 {
      %93 = arith.index_cast %arg11 : i32 to index
      %c0_71 = arith.constant 0 : index
      %c0_72 = arith.constant 0 : index
      %94 = vector.load %arg2[%93, %c0_71, %c0_72] : memref<32x3x128xf32, #tpu.memory_space<vmem>>, vector<1x3x128xf32>
      %95 = vector.shape_cast %94 : vector<1x3x128xf32> to vector<3x128xf32>
      %96 = vector.extract_strided_slice %95 {offsets = [0, 0], sizes = [1, 128], strides = [1, 1]} : vector<3x128xf32> to vector<1x128xf32>
      %97 = vector.extract_strided_slice %95 {offsets = [1, 0], sizes = [1, 128], strides = [1, 1]} : vector<3x128xf32> to vector<1x128xf32>
      %98 = vector.extract_strided_slice %95 {offsets = [2, 0], sizes = [1, 128], strides = [1, 1]} : vector<3x128xf32> to vector<1x128xf32>
      %99 = arith.index_cast %arg11 : i32 to index
      %c0_73 = arith.constant 0 : index
      %c0_74 = arith.constant 0 : index
      %c0_75 = arith.constant 0 : index
      %100 = vector.load %arg4[%99, %c0_73, %c0_74, %c0_75] : memref<32x2x16x128xf32, #tpu.memory_space<vmem>>, vector<1x2x16x128xf32>
      %101 = vector.shape_cast %100 : vector<1x2x16x128xf32> to vector<2x16x128xf32>
      %102 = vector.extract_strided_slice %101 {offsets = [0, 0, 0], sizes = [1, 16, 128], strides = [1, 1, 1]} : vector<2x16x128xf32> to vector<1x16x128xf32>
      %103 = vector.shape_cast %102 : vector<1x16x128xf32> to vector<16x128xf32>
      %cst_76 = arith.constant 5.000000e+00 : f32
      %104 = vector.broadcast %cst_76 : f32 to vector<16x128xf32>
      %105 = arith.mulf %103, %104 : vector<16x128xf32>
      %cst_77 = arith.constant 1.000000e+00 : f32
      %106 = vector.broadcast %cst_77 : f32 to vector<16x128xf32>
      %107 = arith.addf %106, %105 : vector<16x128xf32>
      %108 = vector.extract_strided_slice %101 {offsets = [1, 0, 0], sizes = [1, 16, 128], strides = [1, 1, 1]} : vector<2x16x128xf32> to vector<1x16x128xf32>
      %109 = vector.shape_cast %108 : vector<1x16x128xf32> to vector<16x128xf32>
      %cst_78 = arith.constant 4.700000e+00 : f32
      %110 = vector.broadcast %cst_78 : f32 to vector<16x128xf32>
      %111 = arith.mulf %109, %110 : vector<16x128xf32>
      %cst_79 = arith.constant 3.000000e-01 : f32
      %112 = vector.broadcast %cst_79 : f32 to vector<16x128xf32>
      %113 = arith.addf %112, %111 : vector<16x128xf32>
      %114 = vector.broadcast %97 : vector<1x128xf32> to vector<16x128xf32>
      %115 = arith.cmpf oge, %114, %50 : vector<16x128xf32>
      %116 = arith.extui %115 : vector<16x128xi1> to vector<16x128xi32>
      %117 = arith.sitofp %116 : vector<16x128xi32> to vector<16x128xf32>
      %118 = vector.broadcast %96 : vector<1x128xf32> to vector<16x128xf32>
      %119 = arith.mulf %118, %117 : vector<16x128xf32>
      %120 = vector.broadcast %97 : vector<1x128xf32> to vector<16x128xf32>
      %121 = arith.cmpf olt, %120, %50 : vector<16x128xf32>
      %122 = arith.extui %121 : vector<16x128xi1> to vector<16x128xi32>
      %123 = arith.sitofp %122 : vector<16x128xi32> to vector<16x128xf32>
      %124 = vector.broadcast %96 : vector<1x128xf32> to vector<16x128xf32>
      %125 = arith.mulf %124, %123 : vector<16x128xf32>
      %126 = arith.addf %arg12, %125 : vector<16x128xf32>
      %127 = vector.broadcast %97 : vector<1x128xf32> to vector<16x128xf32>
      %128 = arith.subf %127, %50 : vector<16x128xf32>
      %129 = arith.mulf %56, %128 : vector<16x128xf32>
      %cst_80 = arith.constant 0.000000e+00 : f32
      %130 = vector.broadcast %cst_80 : f32 to vector<16x128xf32>
      %131 = arith.maximumf %129, %130 : vector<16x128xf32>
      %132 = arith.minimumf %131, %126 : vector<16x128xf32>
      %133 = arith.addf %arg13, %132 : vector<16x128xf32>
      %134 = arith.subf %126, %132 : vector<16x128xf32>
      %135 = vector.broadcast %97 : vector<1x128xf32> to vector<16x128xf32>
      %136 = arith.subf %50, %135 : vector<16x128xf32>
      %137 = arith.mulf %80, %136 : vector<16x128xf32>
      %cst_81 = arith.constant 0.000000e+00 : f32
      %138 = vector.broadcast %cst_81 : f32 to vector<16x128xf32>
      %139 = arith.maximumf %137, %138 : vector<16x128xf32>
      %140 = arith.minimumf %139, %133 : vector<16x128xf32>
      %141 = arith.addf %134, %140 : vector<16x128xf32>
      %142 = arith.subf %133, %140 : vector<16x128xf32>
      %143 = arith.mulf %68, %141 : vector<16x128xf32>
      %144 = arith.subf %142, %143 : vector<16x128xf32>
      %cst_82 = arith.constant 0.000000e+00 : f32
      %145 = vector.broadcast %cst_82 : f32 to vector<16x128xf32>
      %146 = arith.maximumf %144, %145 : vector<16x128xf32>
      %147 = arith.subf %142, %146 : vector<16x128xf32>
      %148 = arith.mulf %arg14, %76 : vector<16x128xf32>
      %149 = math.powf %148, %107 : vector<16x128xf32>
      %cst_83 = arith.constant 0.000000e+00 : f32
      %cst_84 = arith.constant 1.000000e+00 : f32
      %150 = vector.broadcast %cst_83 : f32 to vector<16x128xf32>
      %151 = arith.maximumf %150, %149 : vector<16x128xf32>
      %152 = vector.broadcast %cst_84 : f32 to vector<16x128xf32>
      %153 = arith.minimumf %152, %151 : vector<16x128xf32>
      %154 = arith.addf %119, %146 : vector<16x128xf32>
      %155 = arith.mulf %154, %153 : vector<16x128xf32>
      %156 = arith.addf %arg14, %119 : vector<16x128xf32>
      %157 = arith.addf %156, %146 : vector<16x128xf32>
      %158 = arith.subf %157, %155 : vector<16x128xf32>
      %159 = arith.subf %158, %8 : vector<16x128xf32>
      %cst_85 = arith.constant 0.000000e+00 : f32
      %160 = vector.broadcast %cst_85 : f32 to vector<16x128xf32>
      %161 = arith.maximumf %159, %160 : vector<16x128xf32>
      %162 = arith.subf %158, %161 : vector<16x128xf32>
      %163 = arith.mulf %162, %79 : vector<16x128xf32>
      %164 = math.powf %163, %113 : vector<16x128xf32>
      %cst_86 = arith.constant 0.000000e+00 : f32
      %cst_87 = arith.constant 1.000000e+00 : f32
      %165 = vector.broadcast %cst_86 : f32 to vector<16x128xf32>
      %166 = arith.maximumf %165, %164 : vector<16x128xf32>
      %167 = vector.broadcast %cst_87 : f32 to vector<16x128xf32>
      %168 = arith.minimumf %167, %166 : vector<16x128xf32>
      %169 = vector.broadcast %98 : vector<1x128xf32> to vector<16x128xf32>
      %170 = arith.mulf %169, %168 : vector<16x128xf32>
      %171 = arith.minimumf %162, %170 : vector<16x128xf32>
      %172 = arith.subf %162, %171 : vector<16x128xf32>
      %cst_88 = arith.constant 9.99999974E-6 : f32
      %173 = vector.broadcast %cst_88 : f32 to vector<16x128xf32>
      %174 = arith.maximumf %172, %173 : vector<16x128xf32>
      %175 = arith.mulf %74, %arg16 : vector<16x128xf32>
      %176 = arith.mulf %174, %76 : vector<16x128xf32>
      %cst_89 = arith.constant 1.000000e+00 : f32
      %177 = vector.broadcast %cst_89 : f32 to vector<16x128xf32>
      %178 = arith.minimumf %176, %177 : vector<16x128xf32>
      %cst_90 = arith.constant 1.000000e+00 : f32
      %179 = vector.broadcast %cst_90 : f32 to vector<16x128xf32>
      %180 = arith.subf %179, %178 : vector<16x128xf32>
      %181 = arith.mulf %175, %180 : vector<16x128xf32>
      %182 = arith.minimumf %arg16, %181 : vector<16x128xf32>
      %183 = arith.addf %174, %182 : vector<16x128xf32>
      %cst_91 = arith.constant 9.99999974E-6 : f32
      %184 = vector.broadcast %cst_91 : f32 to vector<16x128xf32>
      %185 = arith.maximumf %183, %184 : vector<16x128xf32>
      %186 = arith.subf %arg16, %182 : vector<16x128xf32>
      %cst_92 = arith.constant 9.99999974E-6 : f32
      %187 = vector.broadcast %cst_92 : f32 to vector<16x128xf32>
      %188 = arith.maximumf %186, %187 : vector<16x128xf32>
      %189 = arith.addf %arg15, %155 : vector<16x128xf32>
      %190 = arith.addf %189, %161 : vector<16x128xf32>
      %191 = arith.minimumf %190, %38 : vector<16x128xf32>
      %192 = arith.subf %190, %191 : vector<16x128xf32>
      %193 = arith.subf %192, %44 : vector<16x128xf32>
      %cst_93 = arith.constant 0.000000e+00 : f32
      %194 = vector.broadcast %cst_93 : f32 to vector<16x128xf32>
      %195 = arith.maximumf %193, %194 : vector<16x128xf32>
      %196 = arith.mulf %14, %195 : vector<16x128xf32>
      %197 = arith.subf %192, %196 : vector<16x128xf32>
      %198 = arith.mulf %20, %197 : vector<16x128xf32>
      %199 = arith.subf %197, %198 : vector<16x128xf32>
      %200 = arith.addf %188, %191 : vector<16x128xf32>
      %201 = arith.mulf %26, %200 : vector<16x128xf32>
      %202 = arith.subf %200, %201 : vector<16x128xf32>
      %203 = arith.addf %196, %198 : vector<16x128xf32>
      %204 = arith.addf %203, %201 : vector<16x128xf32>
      %cst_94 = arith.constant dense<0.000000e+00> : vector<128xf32>
      %205 = vector.multi_reduction <add>, %204, %cst_94 [0] : vector<16x128xf32> to vector<128xf32>
      %206 = vector.shape_cast %205 : vector<128xf32> to vector<1x128xf32>
      %cst_95 = arith.constant 6.250000e-02 : f32
      %207 = vector.broadcast %cst_95 : f32 to vector<1x128xf32>
      %208 = arith.mulf %206, %207 : vector<1x128xf32>
      %cst_96 = arith.constant dense<0.000000e+00> : vector<128xf32>
      %209 = vector.multi_reduction <add>, %196, %cst_96 [0] : vector<16x128xf32> to vector<128xf32>
      %210 = vector.shape_cast %209 : vector<128xf32> to vector<1x128xf32>
      %cst_97 = arith.constant 6.250000e-02 : f32
      %211 = vector.broadcast %cst_97 : f32 to vector<1x128xf32>
      %212 = arith.mulf %210, %211 : vector<1x128xf32>
      %cst_98 = arith.constant dense<0.000000e+00> : vector<128xf32>
      %213 = vector.multi_reduction <add>, %198, %cst_98 [0] : vector<16x128xf32> to vector<128xf32>
      %214 = vector.shape_cast %213 : vector<128xf32> to vector<1x128xf32>
      %cst_99 = arith.constant 6.250000e-02 : f32
      %215 = vector.broadcast %cst_99 : f32 to vector<1x128xf32>
      %216 = arith.mulf %214, %215 : vector<1x128xf32>
      %cst_100 = arith.constant dense<0.000000e+00> : vector<128xf32>
      %217 = vector.multi_reduction <add>, %201, %cst_100 [0] : vector<16x128xf32> to vector<128xf32>
      %218 = vector.shape_cast %217 : vector<128xf32> to vector<1x128xf32>
      %cst_101 = arith.constant 6.250000e-02 : f32
      %219 = vector.broadcast %cst_101 : f32 to vector<1x128xf32>
      %220 = arith.mulf %218, %219 : vector<1x128xf32>
      %cst_102 = arith.constant dense<0.000000e+00> : vector<128xf32>
      %221 = vector.multi_reduction <add>, %171, %cst_102 [0] : vector<16x128xf32> to vector<128xf32>
      %222 = vector.shape_cast %221 : vector<128xf32> to vector<1x128xf32>
      %cst_103 = arith.constant 6.250000e-02 : f32
      %223 = vector.broadcast %cst_103 : f32 to vector<1x128xf32>
      %224 = arith.mulf %222, %223 : vector<1x128xf32>
      %225 = tpu.concatenate %208, %212, %216, %220, %224 in 0 : vector<1x128xf32>, vector<1x128xf32>, vector<1x128xf32>, vector<1x128xf32>, vector<1x128xf32> -> vector<5x128xf32>
      %226 = arith.index_cast %arg11 : i32 to index
      %c0_104 = arith.constant 0 : index
      %c0_105 = arith.constant 0 : index
      %227 = vector.load %arg5[%226, %c0_104, %c0_105] : memref<32x5x128xf32, #tpu.memory_space<vmem>>, vector<1x5x128xf32>
      %228 = vector.shape_cast %227 : vector<1x5x128xf32> to vector<5x128xf32>
      %229 = vector.shape_cast %225 : vector<5x128xf32> to vector<1x5x128xf32>
      tpu.vector_store %arg5[%226, %c0_104, %c0_105], %229 {strides = array<i32>} : memref<32x5x128xf32, #tpu.memory_space<vmem>>, vector<1x5x128xf32>,
      scf.yield %141, %147, %185, %199, %202 : vector<16x128xf32>, vector<16x128xf32>, vector<16x128xf32>, vector<16x128xf32>, vector<16x128xf32>
    }
    %c32_i32_60 = arith.constant 32 : i32
    %c0_61 = arith.constant 0 : index
    %c0_62 = arith.constant 0 : index
    %88 = vector.load %arg6[%c0_61, %c0_62] : memref<16x128xf32, #tpu.memory_space<vmem>>, vector<16x128xf32>
    tpu.vector_store %arg6[%c0_61, %c0_62], %87#0 {strides = array<i32>} : memref<16x128xf32, #tpu.memory_space<vmem>>, vector<16x128xf32>,
    %c0_63 = arith.constant 0 : index
    %c0_64 = arith.constant 0 : index
    %89 = vector.load %arg7[%c0_63, %c0_64] : memref<16x128xf32, #tpu.memory_space<vmem>>, vector<16x128xf32>
    tpu.vector_store %arg7[%c0_63, %c0_64], %87#1 {strides = array<i32>} : memref<16x128xf32, #tpu.memory_space<vmem>>, vector<16x128xf32>,
    %c0_65 = arith.constant 0 : index
    %c0_66 = arith.constant 0 : index
    %90 = vector.load %arg8[%c0_65, %c0_66] : memref<16x128xf32, #tpu.memory_space<vmem>>, vector<16x128xf32>
    tpu.vector_store %arg8[%c0_65, %c0_66], %87#2 {strides = array<i32>} : memref<16x128xf32, #tpu.memory_space<vmem>>, vector<16x128xf32>,
    %c0_67 = arith.constant 0 : index
    %c0_68 = arith.constant 0 : index
    %91 = vector.load %arg9[%c0_67, %c0_68] : memref<16x128xf32, #tpu.memory_space<vmem>>, vector<16x128xf32>
    tpu.vector_store %arg9[%c0_67, %c0_68], %87#3 {strides = array<i32>} : memref<16x128xf32, #tpu.memory_space<vmem>>, vector<16x128xf32>,
    %c0_69 = arith.constant 0 : index
    %c0_70 = arith.constant 0 : index
    %92 = vector.load %arg10[%c0_69, %c0_70] : memref<16x128xf32, #tpu.memory_space<vmem>>, vector<16x128xf32>
    tpu.vector_store %arg10[%c0_69, %c0_70], %87#4 {strides = array<i32>} : memref<16x128xf32, #tpu.memory_space<vmem>>, vector<16x128xf32>,
    return
  }
  func.func @transform_0(%arg0: i32, %arg1: i32) -> (i32, i32, i32) {
    %c0_i32 = arith.constant 0 : i32
    %c0_i32_0 = arith.constant 0 : i32
    return %arg1, %c0_i32, %arg0 : i32, i32, i32
  }
  func.func @transform_1(%arg0: i32, %arg1: i32) -> (i32, i32, i32) {
    %c0_i32 = arith.constant 0 : i32
    %c0_i32_0 = arith.constant 0 : i32
    %c0_i32_1 = arith.constant 0 : i32
    return %c0_i32, %c0_i32_0, %arg0 : i32, i32, i32
  }
  func.func @transform_2(%arg0: i32, %arg1: i32) -> (i32, i32, i32, i32) {
    %c0_i32 = arith.constant 0 : i32
    %c0_i32_0 = arith.constant 0 : i32
    %c0_i32_1 = arith.constant 0 : i32
    return %arg1, %c0_i32, %c0_i32_0, %arg0 : i32, i32, i32, i32
  }
  func.func @transform_3(%arg0: i32, %arg1: i32) -> (i32, i32, i32) {
    %c0_i32 = arith.constant 0 : i32
    %c0_i32_0 = arith.constant 0 : i32
    return %arg1, %c0_i32, %arg0 : i32, i32, i32
  }
}

</mosaic_0001>

<bundles_post_ra>
// kernel: hbv_forward.1
= control target key start
LH: loop header
LB: loop body
LE: loop exit
PB: predicated region body
PF: predicated region fallthrough
CT: control target
= control target key end

     0   :  { %s1537_s12 = smov 0   ;;  %s1539_s13 = smov 0   ;;  %s2476_s0 = inlined_call_operand.vmem [shape: f32[64,3,128], index: 0, kind: input, shape index: {}]   ;;  %s2477_s1 = inlined_call_operand.vmem [shape: f32[14,16,128], index: 1, kind: input, shape index: {}]   ;;  %s2478_s2 = inlined_call_operand.vmem [shape: f32[64,2,16,128], index: 2, kind: input, shape index: {}]   ;;  %s2479_s3 = inlined_call_operand.vmem [shape: f32[64,5,128], index: 3, kind: output, shape index: {}]  }
   0x1   :  { %s1541_s14 = smov 0  }
   0x2 LB: > { %s22_s15 = sadd.s32 1, %s1463_s13  ;;  %p822_p0 = scmp.ge.s32.totalorder %s1467_s14, 1  ;;  %s1467_s14 = sphi %s1541_s14, %s13_s14   ;;  %s1463_s13 = sphi %s1539_s13, %s2576_s13   ;;  %s1459_s12 = sphi %s1537_s12, %s2575_s12  }
   0x3   : > { %p23_p1 = scmp.ge.s32.totalorder %s22_s15, 2  ;;  %p183_p2 = scmp.lt.s32.totalorder %s1467_s14, 3 }
   0x5   : > { %s2578_s15 = smov (%p23_p1, %s22_s15), 0  ;;  %p184_p3 = pnand %p822_p0, %p183_p2 }
   0x7   : > { %187 = sbr.rel (%p184_p3) target bundleno = 276 (0x114), region = 32 }
   0xc   : > { %s823_s16 = sshll.u32 %s1459_s12, 5  ;;  %p830_p5 = scmp.ne.s32.totalorder %s1459_s12, 0 }
   0xd   : > { %p227_p4 = scmp.lt.s32.totalorder %s823_s16, 63 }
   0xf   : > { %s2580_s16 = smov (!%p227_p4, %s823_s16), 63  ;;  %261 = sbr.rel (%p830_p5) target bundleno = 31 (0x1f), region = 36 }
  0x10   : > { %s824_s17 = sshll.u32 %s2580_s16, 2  ;;  %s864_s18 = sshll.u32 %s2580_s16, 5 }
  0x11   : > { %s1558_s21 = scalar_lea.vmem %s2476_s0, %s824_s17  ;;  %s1563_s24 = scalar_lea.vmem %s2478_s2, %s864_s18 }
  0x12   : > { %s829_s25 = sshll.u32 %s2580_s16, 3 }
  0x13   : > { %s1568_s28 = scalar_lea.vmem %s2479_s3, %s829_s25 }
  0x14   : > { %v1513_v0 = vmov 0.001  }
  0x15   : > { %262 = vst [vmem:[#allocation2] sm:$0xff] %v1513_v0 }
  0x16   : > { %263 = vst [vmem:[#allocation2 + $0x8] sm:$0xff] %v1513_v0 }
  0x17   : > { %264 = vst [vmem:[#allocation3 + $0x8] sm:$0xff] %v1513_v0 }
  0x18   : > { %265 = vst [vmem:[#allocation3] sm:$0xff] %v1513_v0 }
  0x19   : > { %266 = vst [vmem:[#allocation4 + $0x8] sm:$0xff] %v1513_v0 }
  0x1a   : > { %267 = vst [vmem:[#allocation4] sm:$0xff] %v1513_v0 }
  0x1b   : > { %268 = vst [vmem:[#allocation5] sm:$0xff] %v1513_v0 }
  0x1c   : > { %269 = vst [vmem:[#allocation5 + $0x8] sm:$0xff] %v1513_v0 }
  0x1d   : > { %270 = vst [vmem:[#allocation6] sm:$0xff] %v1513_v0 }
  0x1e   : > { %271 = vst [vmem:[#allocation6 + $0x8] sm:$0xff] %v1513_v0 }
  0x1f PF: > { %v831_v1 = vld [vmem:[%s2477_s1 + $0x10] sm:$0xff]  ;;  %v832_v2 = vld [vmem:[%s2477_s1 + $0x18] sm:$0xff]  ;;  %v833_v3 = vld [vmem:[%s2477_s1 + $0x20] sm:$0xff]  ;;  %s1759_s8 = smov 0  }
  0x20   : > { %v275_v4 = vmul.f32 950.0, %v831_v1  ;;  %v276_v5 = vmul.f32 950.0, %v832_v2  ;;  %v834_v6 = vld [vmem:[%s2477_s1 + $0x28] sm:$0xff]  ;;  %v282_v7 = vmul.f32 0.85, %v833_v3  ;;  %v835_v8 = vld [vmem:[%s2477_s1 + $0x30] sm:$0xff] }
  0x21   : > { %v283_v9 = vmul.f32 0.85, %v834_v6  ;;  %v836_v10 = vld [vmem:[%s2477_s1 + $0x38] sm:$0xff]  ;;  %v289_v11 = vmul.f32 0.49, %v835_v8  ;;  %v837_v12 = vld [vmem:[%s2477_s1 + $0x40] sm:$0xff] }
  0x22   : > { %v1591_v13 = vadd.f32 50.0, %v275_v4  ;;  %v1593_v14 = vadd.f32 50.0, %v276_v5  ;;  %v1595_v15 = vadd.f32 0.05, %v282_v7  ;;  %v290_v16 = vmul.f32 0.49, %v836_v10 }
  0x23   : > { %v1597_v17 = vadd.f32 0.05, %v283_v9  ;;  %v1599_v18 = vadd.f32 0.01, %v289_v11  ;;  %v838_v19 = vld [vmem:[%s2477_s1 + $0x48] sm:$0xff]  ;;  %v839_v20 = vld [vmem:[%s2477_s1 + $0x50] sm:$0xff] }
  0x24   : > { %v1607_v21 = vadd.f32 0.01, %v290_v16  ;;  %v296_v22 = vmul.f32 0.199, %v837_v12  ;;  %v297_v23 = vmul.f32 0.199, %v838_v19  ;;  %1385 = vrcp.f32 %v1591_v13 }
  0x25   : > { %v840_v24 = vld [vmem:[%s2477_s1 + $0x58] sm:$0xff]  ;;  %v303_v25 = vmul.f32 0.8, %v839_v20  ;;  %v841_v26 = vld [vmem:[%s2477_s1 + $0x60] sm:$0xff]  ;;  %v842_v27 = vld [vmem:[%s2477_s1 + $0x68] sm:$0xff]  ;;  %1387 = vrcp.f32 %v1593_v14  ;;  %vm359_vm0 = vweird.f32 %v1591_v13  ;;  %v365_v46 = vand.u32 2147483648, %v1591_v13 }
  0x26   : > { %v1620_v28 = vadd.f32 0.001, %v296_v22  ;;  %v1622_v29 = vadd.f32 0.001, %v297_v23  ;;  %v304_v30 = vmul.f32 0.8, %v840_v24  ;;  %vm374_vm1 = vweird.f32 %v1593_v14 }
  0x27   : > { %v305_v31 = vadd.f32 0.2, %v303_v25  ;;  %v1624_v32 = vmul.f32 10.0, %v841_v26  ;;  %v1626_v33 = vmul.f32 10.0, %v842_v27  ;;  %v843_v34 = vld [vmem:[%s2477_s1 + $0x70] sm:$0xff]  ;;  %v844_v35 = vld [vmem:[%s2477_s1 + $0x78] sm:$0xff] }
  0x28   : > { %v306_v36 = vadd.f32 0.2, %v304_v30  ;;  %v1634_v37 = vmul.f32 100.0, %v843_v34  ;;  %v1636_v38 = vmul.f32 100.0, %v844_v35  ;;  %v845_v39 = vld [vmem:[%s2477_s1 + $0x80] sm:$0xff]  ;;  %v846_v40 = vld [vmem:[%s2477_s1 + $0x88] sm:$0xff] }
  0x29   : > { %v324_v41 = vmul.f32 5.0, %v845_v39  ;;  %v325_v42 = vmul.f32 5.0, %v846_v40  ;;  %v847_v43 = vld [vmem:[%s2477_s1 + $0x90] sm:$0xff]  ;;  %v848_v44 = vld [vmem:[%s2477_s1 + $0x98] sm:$0xff]  ;;  %v849_v45 = vld [vmem:[%s2477_s1 + $0xa0] sm:$0xff]  ;;  %v1663_v52 = vmul.f32 %v305_v31, %v1591_v13  ;;  %v380_v8 = vand.u32 2147483648, %v1593_v14 }
  0x2a   : > { %v1386_v47 = vpop.eup %1385  ;;  %v331_v48 = vmul.f32 9.5, %v847_v43  ;;  %v332_v49 = vmul.f32 9.5, %v848_v44  ;;  %v850_v50 = vld [vmem:[%s2477_s1 + $0xa8] sm:$0xff]  ;;  %v851_v51 = vld [vmem:[%s2477_s1 + $0xb0] sm:$0xff]  ;;  %v338_v56 = vmul.f32 0.1, %v849_v45  ;;  %v1683_v63 = vmul.f32 %v306_v36, %v1593_v14 }
  0x2b   : > { %v1388_v53 = vpop.eup %1387  ;;  %v1665_v54 = vadd.f32 -2.5, %v324_v41  ;;  %v1667_v55 = vadd.f32 -2.5, %v325_v42  ;;  %v852_v57 = vld [vmem:[%s2477_s1 + $0xb8] sm:$0xff]  ;;  %v1675_v58 = vld [vmem:[%s2477_s1 + $0xd0] sm:$0xff]  ;;  %v355_v59 = vmul.f32 %v1386_v47, %v1591_v13  ;;  %v339_v60 = vmul.f32 0.1, %v850_v50 }
  0x2c   : > { %v1678_v61 = vmul.f32 0.2, %v851_v51  ;;  %v1680_v62 = vmul.f32 0.2, %v852_v57  ;;  %v1688_v0 = vld [vmem:[%s2477_s1 + $0xd8] sm:$0xff]  ;;  %vm360_vm2 = vweird.f32 %v1386_v47  ;;  %v370_v3 = vmul.f32 %v1388_v53, %v1593_v14  ;;  %v1692_v4 = vld [vmem:[#allocation2] sm:$0xff]  }
  0x2d   : > { %v356_v1 = vsub.f32 1.0, %v355_v59  ;;  %v363_v2 = vand.u32 2147483647, %v1591_v13  ;;  %v1694_v5 = vld [vmem:[#allocation2 + $0x8] sm:$0xff]   ;;  %v1696_v6 = vadd.f32 0.5, %v331_v48  ;;  %1389 = vrcp.f32 %v1663_v52  ;;  %v420_v9 = vld [vmem:[#allocation3 + $0x8] sm:$0xff]   ;;  %vm1706_vm4 = vmor %vm359_vm0, %vm360_vm2 }
  0x2e   : > { %2487 = vst [vmem:[#allocation7_spill] sm:$0xff] %v1678_v61  ;;  %v378_v7 = vand.u32 2147483647, %v1593_v14  ;;  %v421_v10 = vld [vmem:[#allocation3] sm:$0xff]   ;;  %v1701_v11 = vadd.f32 0.5, %v332_v49  ;;  %v371_v16 = vsub.f32 1.0, %v370_v3  ;;  %vm375_vm3 = vweird.f32 %v1388_v53 }
  0x2f   : > { %2488 = vst [vmem:[#allocation8_spill] sm:$0xff] %v1680_v62  ;;  %v357_v12 = vmul.f32 %v1386_v47, %v356_v1  ;;  %v422_v19 = vld [vmem:[#allocation4 + $0x8] sm:$0xff]   ;;  %v423_v20 = vld [vmem:[#allocation4] sm:$0xff]   ;;  %v366_v23 = vor.u32 1.1754944e-38, %v365_v46  ;;  %v424_v24 = vld [vmem:[#allocation5] sm:$0xff]   ;;  %vm364_vm5 = vcmp.eq.f32.partialorder %v363_v2, 8.507059e+37  ;;  %1391 = vrcp.f32 %v1683_v63 }
  0x30   : > { %2489 = vst [vmem:[#allocation9_spill] sm:$0xff] %v1696_v6  ;;  %v372_v26 = vmul.f32 %v1388_v53, %v371_v16  ;;  %v425_v27 = vld [vmem:[#allocation5 + $0x8] sm:$0xff]   ;;  %v426_v30 = vld [vmem:[#allocation6] sm:$0xff]   ;;  %v427_v31 = vld [vmem:[#allocation6 + $0x8] sm:$0xff]   ;;  %vm379_vm7 = vcmp.eq.f32.partialorder %v378_v7, 8.507059e+37  ;;  %v381_v34 = vor.u32 1.1754944e-38, %v380_v8  ;;  %v1716_v39 = vmul.f32 %v338_v56, %v1696_v6 }
  0x31   : > { %2490 = vst [vmem:[#allocation10_spill] sm:$0xff] %v1701_v11  ;;  %v358_v25 = vadd.f32 %v1386_v47, %v357_v12  ;;  %vm376_vm6 = vmor %vm374_vm1, %vm375_vm3  ;;  %v1719_v40 = vmul.f32 %v339_v60, %v1701_v11  ;;  %v397_v46 = vand.u32 2147483648, %v1663_v52  ;;  %vm391_vm8 = vweird.f32 %v1663_v52 }
  0x32   : > { %v373_v36 = vadd.f32 %v1388_v53, %v372_v26  ;;  %2493 = vst [vmem:[#allocation11_spill] sm:$0xff] %v1716_v39  ;;  %vm406_vm10 = vweird.f32 %v1683_v63  ;;  %v410_v59 = vand.u32 2147483647, %v1683_v63 }
  0x33   : > { %v362_v35 = vsel %vm1706_vm4, %v1386_v47, %v358_v25  ;;  %2494 = vst [vmem:[#allocation12_spill] sm:$0xff] %v1719_v40  ;;  %v1390_v41 = vpop.eup %1389  ;;  %v395_v47 = vand.u32 2147483647, %v1663_v52  ;;  %v398_v56 = vor.u32 1.1754944e-38, %v397_v46 }
  0x34   : > { %v1721_v42 = vsel %vm364_vm5, %v366_v23, %v362_v35  ;;  %v377_v43 = vsel %vm376_vm6, %v1388_v53, %v373_v36  ;;  %v387_v44 = vmul.f32 %v1390_v41, %v1663_v52  ;;  %vm392_vm9 = vweird.f32 %v1390_v41 }
  0x35   : > { %v1724_v45 = vsel %vm379_vm7, %v381_v34, %v377_v43  ;;  %v1392_v48 = vpop.eup %1391  ;;  %v412_v53 = vand.u32 2147483648, %v1683_v63  ;;  %vm393_vm11 = vmor %vm391_vm8, %vm392_vm9  ;;  %vm396_vm13 = vcmp.eq.f32.partialorder %v395_v47, 8.507059e+37  ;;  %vm411_vm15 = vcmp.eq.f32.partialorder %v410_v59, 8.507059e+37 }
  0x36   : > { %v388_v49 = vsub.f32 1.0, %v387_v44  ;;  %v402_v50 = vmul.f32 %v1392_v48, %v1683_v63  ;;  %vm407_vm12 = vweird.f32 %v1392_v48 }
  0x37   : > { %vm408_vm14 = vmor %vm406_vm10, %vm407_vm12  ;;  %v413_v3 = vor.u32 1.1754944e-38, %v412_v53 }
  0x38   : > { %v389_v51 = vmul.f32 %v1390_v41, %v388_v49  ;;  %v403_v57 = vsub.f32 1.0, %v402_v50 }
  0x3a   : > { %v390_v60 = vadd.f32 %v1390_v41, %v389_v51  ;;  %v404_v1 = vmul.f32 %v1392_v48, %v403_v57 }
  0x3c   : > { %v394_v2 = vsel %vm393_vm11, %v1390_v41, %v390_v60  ;;  %v405_v7 = vadd.f32 %v1392_v48, %v404_v1 }
  0x3d   : > { %v1733_v52 = vsel %vm396_vm13, %v398_v56, %v394_v2 }
  0x3e   : > { %v409_v8 = vsel %vm408_vm14, %v1392_v48, %v405_v7 }
  0x3f   : > { %v1735_v12 = vsel %vm411_vm15, %v413_v3, %v409_v8 }
  0x40 LB: >> { %s855_s9 = sshll.u32 %s1511_s8, 2  ;;  %v1798_v23 = vmul.f32 %v1491_v19, %v1721_v42  ;;  %v2480_v25 = vmov 0.0   ;;  %v2495_v6 = vld [vmem:[#allocation9_spill] sm:$0xff]  ;;  %v2496_v11 = vld [vmem:[#allocation10_spill] sm:$0xff]  ;;  %v1820_v47 = vmul.f32 %v1487_v20, %v1724_v45  ;;  %v2497_v39 = vld [vmem:[#allocation11_spill] sm:$0xff]  ;;  %s856_s11 = sshll.u32 %s1511_s8, 5  ;;  %s1511_s8 = sphi %s1759_s8, %s433_s8   ;;  %v1507_v4 = vphi %v1692_v4, %v2570_v4   ;;  %v1503_v5 = vphi %v1694_v5, %v2569_v5   ;;  %v1499_v9 = vphi %v420_v9, %v2568_v9   ;;  %v1495_v10 = vphi %v421_v10, %v2567_v10   ;;  %v1491_v19 = vphi %v422_v19, %v2566_v19   ;;  %v1487_v20 = vphi %v423_v20, %v2565_v20   ;;  %v1483_v24 = vphi %v424_v24, %v2564_v24   ;;  %v1479_v27 = vphi %v425_v27, %v2563_v27   ;;  %v1475_v30 = vphi %v426_v30, %v2562_v30   ;;  %v1471_v31 = vphi %v427_v31, %v2561_v31  }
  0x41   : >> { %s445_s10 = scalar_lea.vmem %s1558_s21, %s855_s9  ;;  %v2498_v40 = vld [vmem:[#allocation12_spill] sm:$0xff]  ;;  %v2502_v61 = vld [vmem:[#allocation7_spill] sm:$0xff]  ;;  %s1842_s12 = scalar_lea.vmem %s1563_s24, %s856_s11 }
  0x42   : >> { %v1788_v63 = vld [vmem:[%s445_s10] sm:$0x7]  ;;  %v1823_v50 = vand.u32 2147483647, %v1798_v23  ;;  %v1829_v3 = vand.u32 2147483647, %v1820_v47 }
  0x43   : >> { %v1791_v16 = vperm.slane %v1788_v63, 1  ;;  %v1794_v22 = vperm.slane %v1788_v63, 0  ;;  %v2503_v62 = vld [vmem:[#allocation8_spill] sm:$0xff]  ;;  %vm933_vm13 = vcmp.eq.f32.partialorder %v1798_v23, 0  ;;  %vm932_vm15 = vcmp.lt.f32.partialorder %v1798_v23, 0  ;;  %s861_s16 = sshll.u32 %s1511_s8, 3 }
  0x44   : >> { %v871_v1 = vand.u32 8388607, %v1823_v50  ;;  %vm904_vm5 = vcmp.lt.f32.partialorder %v1823_v50, 0.0  ;;  %vm905_vm6 = vweird.f32 %v1823_v50  ;;  %vm902_vm9 = vcmp.eq.f32.partialorder %v1823_v50, 1.0  ;;  %s653_s17 = scalar_lea.vmem %s1568_s28, %s861_s16  ;;  %s433_s8 = sadd.s32 1, %s1511_s8  }
  0x45   : >> { %vm471_vm0 = vcmp.lt.f32.partialorder %v1791_v16, %v1665_v54  ;;  %vm472_vm1 = vcmp.lt.f32.partialorder %v1791_v16, %v1667_v55  ;;  %v481_v35 = vsub.f32 %v1791_v16, %v1665_v54  ;;  %v482_v36 = vsub.f32 %v1791_v16, %v1667_v55  ;;  %p430_p6 = scmp.ge.s32.totalorder %s433_s8, 32  }
  0x46   : >> { %v859_v26 = vsel %vm471_vm0, 1.0, %v2480_v25  ;;  %v860_v34 = vsel %vm472_vm1, 1.0, %v2480_v25  ;;  %v493_v44 = vsub.f32 %v1665_v54, %v1791_v16  ;;  %v494_v46 = vsub.f32 %v1667_v55, %v1791_v16 }
  0x47   : >> { %v477_v41 = vmul.f32 %v859_v26, %v1794_v22  ;;  %v478_v43 = vmul.f32 %v860_v34, %v1794_v22  ;;  %v483_v48 = vmul.f32 %v481_v35, %v2495_v6  ;;  %v484_v49 = vmul.f32 %v482_v36, %v2496_v11 }
  0x48   : >> { %v495_v56 = vmul.f32 %v493_v44, %v2497_v39  ;;  %v496_v57 = vmul.f32 %v494_v46, %v2498_v40  ;;  %v872_v34 = vor.u32 8388608, %v871_v1  ;;  %vm903_vm10 = vcmp.eq.f32.partialorder %v1823_v50, 0.0 }
  0x49   : >> { %v479_v51 = vadd.f32 %v1507_v4, %v477_v41  ;;  %v480_v53 = vadd.f32 %v1503_v5, %v478_v43  ;;  %v485_v59 = vmax.f32 %v483_v48, 0.0  ;;  %v486_v60 = vmax.f32 %v484_v49, 0.0 }
  0x4a   : >> { %v497_v2 = vmax.f32 %v495_v56, 0.0  ;;  %v498_v26 = vmax.f32 %v496_v57, 0.0  ;;  %v874_v41 = vand.u32 8388607, %v872_v34  ;;  %v972_v43 = vand.u32 8388607, %v1829_v3 }
  0x4b   : >> { %v487_v7 = vmin.f32 %v485_v59, %v479_v51  ;;  %v488_v8 = vmin.f32 %v486_v60, %v480_v53  ;;  %v449_v34 = vld [vmem:[%s1842_s12] sm:$0xff]  ;;  %vm462_vm14 = vcmp.ge.f32.partialorder %v1791_v16, %v1665_v54  ;;  %vm936_vm0 = vcmp.gt.f32.partialorder %v1823_v50, 1065353216 }
  0x4c   : >> { %v875_v48 = vor.u32 1065353216, %v874_v41 }
  0x4d   : >> { %v489_v35 = vadd.f32 %v1499_v9, %v487_v7  ;;  %v490_v4 = vadd.f32 %v1495_v10, %v488_v8  ;;  %v491_v5 = vsub.f32 %v479_v51, %v487_v7  ;;  %v492_v36 = vsub.f32 %v480_v53, %v488_v8 }
  0x4e   : >> { %vm876_vm2 = vcmp.ge.f32.partialorder %v875_v48, 1.4142135  ;;  %v877_v57 = vmul.f32 0.5, %v875_v48  ;;  %v973_v9 = vor.u32 8388608, %v972_v43  ;;  %v867_v8 = vand.u32 2139095040, %v1823_v50 }
  0x4f   : >> { %v499_v44 = vmin.f32 %v497_v2, %v489_v35  ;;  %v500_v46 = vmin.f32 %v498_v26, %v490_v4 }
  0x50   : >> { %v878_v53 = vsel %vm876_vm2, %v877_v57, %v875_v48  ;;  %v975_v26 = vand.u32 8388607, %v973_v9  ;;  %v868_v57 = vshrl.u32 %v867_v8, 23 }
  0x51   : >> { %v1833_v49 = vadd.f32 %v499_v44, %v491_v5   ;;  %v1835_v5 = vadd.f32 %v500_v46, %v492_v36   ;;  %v503_v59 = vsub.f32 %v489_v35, %v499_v44  ;;  %v504_v60 = vsub.f32 %v490_v4, %v500_v46 }
  0x52   : >> { %v965_v7 = vadd.f32 -1.0, %v878_v53  ;;  %v453_v46 = vmul.f32 5.0, %v449_v34  ;;  %v964_v11 = vadd.s32 4294967169, %v868_v57  ;;  %v968_v57 = vand.u32 2139095040, %v1829_v3 }
  0x53   : >> { %2499 = vst [vmem:[#allocation13_spill] sm:$0xff] %v1833_v49  ;;  %v2501_v56 = vmov %v1835_v5  ;;  %v505_v10 = vmul.f32 %v1833_v49, %v2502_v61 }
  0x54   : >> { %2500 = vst [vmem:[#allocation14_spill] sm:$0xff] %v1835_v5  ;;  %v506_v51 = vmul.f32 %v2501_v56, %v2503_v62  ;;  %v882_v5 = vmul.f32 %v965_v7, %v965_v7  ;;  %v879_v34 = vadd.s32 1, %v964_v11  ;;  %v969_v62 = vshrl.u32 %v968_v57, 23 }
  0x55   : >> { %v507_v1 = vsub.f32 %v503_v59, %v505_v10 }
  0x56   : >> { %v508_v2 = vsub.f32 %v504_v60, %v506_v51  ;;  %v883_v43 = vmul.f32 0.12621109, %v882_v5  ;;  %v885_v44 = vmul.f32 -0.20706727, %v882_v5  ;;  %v1857_v51 = vor.u32 1065353216, %v975_v26  ;;  %v450_v26 = vld [vmem:[%s1842_s12 + $0x8] sm:$0xff] }
  0x57   : >> { %v1847_v35 = vmax.f32 %v507_v1, 0.0 }
  0x58   : >> { %v1849_v4 = vmax.f32 %v508_v2, 0.0  ;;  %v884_v53 = vadd.f32 0.21545328, %v883_v43  ;;  %v886_v25 = vadd.f32 -0.23896284, %v885_v44  ;;  %v1859_v2 = vadd.f32 1.0, %v453_v46 }
  0x59   : >> { %v1852_v9 = vsub.f32 %v503_v59, %v1847_v35   ;;  %vm977_vm3 = vcmp.ge.f32.partialorder %v1857_v51, 1.4142135 }
  0x5a   : >> { %v1855_v10 = vsub.f32 %v504_v60, %v1849_v4   ;;  %v887_v1 = vmul.f32 %v884_v53, %v882_v5  ;;  %v889_v6 = vmul.f32 %v886_v25, %v882_v5  ;;  %v978_v60 = vmul.f32 0.5, %v1857_v51 }
  0x5b   : >> { %2504 = vst [vmem:[#allocation15_spill] sm:$0xff] %v1852_v9  ;;  %v1868_v43 = vand.u32 2147483647, %v1859_v2  ;;  %vm917_vm4 = vcmp.lt.s32.totalorder %v1859_v2, 0  ;;  %v919_v40 = vfloor.f32 %v1859_v2  ;;  %vm916_vm11 = vcmp.lt.f32.partialorder %v1859_v2, 0 }
  0x5c   : >> { %2505 = vst [vmem:[#allocation16_spill] sm:$0xff] %v1855_v10  ;;  %v888_v59 = vadd.f32 0.28795174, %v887_v1  ;;  %v890_v9 = vadd.f32 -0.3607037, %v889_v6  ;;  %v979_v8 = vsel %vm977_vm3, %v978_v60, %v1857_v51  ;;  %v454_v6 = vmul.f32 5.0, %v450_v26 }
  0x5d   : >> { %v1870_v46 = vadd.f32 -1.0, %v979_v8  ;;  %v918_v60 = vceil.f32 %v1859_v2  ;;  %vm2486_vm7 = vcmp.eq.f32.partialorder %v1868_v43, 2139095040  ;;  %v2514_v51 = vmov 0.0  }
  0x5e   : >> { %v891_v10 = vmul.f32 %v888_v59, %v882_v5  ;;  %v893_v39 = vmul.f32 %v890_v9, %v882_v5  ;;  %v880_v9 = vsel %vm876_vm2, %v879_v34, %v964_v11  ;;  %v1880_v49 = vadd.f32 1.0, %v454_v6 }
  0x5f   : >> { %v983_v59 = vmul.f32 %v1870_v46, %v1870_v46  ;;  %v920_v48 = vsel %vm917_vm4, %v918_v60, %v919_v40  ;;  %vm1918_vm4 = vmand %vm916_vm11, %vm933_vm13 }
  0x60   : >> { %v892_v25 = vadd.f32 0.48090908, %v891_v10  ;;  %v894_v44 = vadd.f32 -0.72134733, %v893_v39  ;;  %v925_v39 = vfloor.f32 %v1868_v43  ;;  %vm921_vm8 = vcmp.ne.f32.partialorder %v1859_v2, %v920_v48 }
  0x61   : >> { %v984_v8 = vmul.f32 0.12621109, %v983_v59  ;;  %v986_v61 = vmul.f32 -0.20706727, %v983_v59  ;;  %vm1892_vm12 = vmor %vm921_vm8, %vm2486_vm7  ;;  %v1515_v48 = vmov 2139095040   ;;  %vm923_vm8 = vcmp.lt.f32.partialorder %v1868_v43, 1266679808 }
  0x62   : >> { %v895_v53 = vmul.f32 %v892_v25, %v882_v5  ;;  %v897_v1 = vmul.f32 %v965_v7, %v894_v44  ;;  %v900_v5 = vcvt.s32.f32 %v880_v9  ;;  %v926_v34 = vcvt.f32.s32 %v925_v39  ;;  %vm929_vm2 = vmneg %vm1892_vm12 }
  0x63   : >> { %v985_v25 = vadd.f32 0.21545328, %v984_v8  ;;  %v987_v44 = vadd.f32 -0.23896284, %v986_v61  ;;  %vm958_vm7 = vcmp.ne.f32.partialorder %v1859_v2, %v1859_v2 }
  0x64   : >> { %v896_v10 = vadd.f32 1.442695, %v895_v53  ;;  %v1065_v53 = vadd.s32 4294967169, %v969_v62  ;;  %v927_v40 = vand.u32 1, %v926_v34 }
  0x65   : >> { %v988_v56 = vmul.f32 %v985_v25, %v983_v59  ;;  %v990_v36 = vmul.f32 %v987_v44, %v983_v59 }
  0x66   : >> { %v898_v26 = vadd.f32 %v897_v1, %v896_v10  ;;  %vm1907_vm1 = vcmp.eq.s32.totalorder %v927_v40, 1 }
  0x67   : >> { %v989_v57 = vadd.f32 0.28795174, %v988_v56  ;;  %v991_v1 = vadd.f32 -0.3607037, %v990_v36  ;;  %v980_v56 = vadd.s32 1, %v1065_v53 }
  0x68   : >> { %v899_v11 = vmul.f32 %v965_v7, %v898_v26  ;;  %v1898_v36 = vand.u32 2147483647, %v1880_v49 }
  0x69   : >> { %v992_v7 = vmul.f32 %v989_v57, %v983_v59  ;;  %v994_v6 = vmul.f32 %v991_v1, %v983_v59  ;;  %v981_v34 = vsel %vm977_vm3, %v980_v56, %v1065_v53  ;;  %v1020_v57 = vfloor.f32 %v1880_v49  ;;  %vm930_vm3 = vmand %vm1907_vm1, %vm929_vm2 }
  0x6a   : >> { %v901_v41 = vadd.f32 %v900_v5, %v899_v11  ;;  %v952_v11 = vsel %vm916_vm11, 0, %v1515_v48  ;;  %v1026_v40 = vfloor.f32 %v1898_v36  ;;  %v857_v53 = vsel %vm462_vm14, 1.0, %v2514_v51  ;;  %vm1961_vm14 = vmand %vm923_vm8, %vm930_vm3 }
  0x6b   : >> { %v993_v10 = vadd.f32 0.48090908, %v992_v7  ;;  %v995_v39 = vadd.f32 -0.72134733, %v994_v6  ;;  %v953_v56 = vxor.u32 2147483648, %v952_v11  ;;  %vm949_vm2 = vcmp.eq.f32.partialorder %v1798_v23, 3212836864 }
  0x6c   : >> { %v906_v61 = vsel %vm905_vm6, %v1823_v50, %v901_v41  ;;  %vm1018_vm6 = vcmp.lt.s32.totalorder %v1880_v49, 0  ;;  %vm1014_vm8 = vcmp.eq.f32.partialorder %v1898_v36, 2139095040 }
  0x6d   : >> { %v907_v9 = vsel %vm904_vm5, nan, %v906_v61  ;;  %v996_v5 = vmul.f32 %v993_v10, %v983_v59  ;;  %v998_v25 = vmul.f32 %v1870_v46, %v995_v39  ;;  %v1019_v59 = vceil.f32 %v1880_v49  ;;  %vm1931_vm5 = vmxor %vm916_vm11, %vm936_vm0 }
  0x6e   : >> { %v908_v60 = vsel %vm903_vm10, -inf, %v907_v9  ;;  %v1001_v9 = vcvt.s32.f32 %v981_v34  ;;  %vm914_vm10 = vcmp.eq.f32.partialorder %v1859_v2, 0  ;;  %vm947_vm1 = vmor %vm1918_vm4, %vm1931_vm5  ;;  %v1516_v10 = vmov 0  }
  0x6f   : >> { %v909_v41 = vsel %vm902_vm9, 0.0, %v908_v60  ;;  %v997_v61 = vadd.f32 1.442695, %v996_v5  ;;  %vm1951_vm9 = vmand %vm932_vm15, %vm1892_vm12  ;;  %v1021_v60 = vsel %vm1018_vm6, %v1019_v59, %v1020_v57  ;;  %vm935_vm12 = vcmp.lt.s32.totalorder %v1798_v23, 0 }
  0x70   : >> { %v910_v8 = vmul.f32 %v909_v41, %v1859_v2  ;;  %v940_v39 = vsel %vm916_vm11, 2139095040, %v1516_v10  ;;  %vm1004_vm4 = vcmp.eq.f32.partialorder %v1829_v3, 0.0  ;;  %vm1005_vm5 = vcmp.lt.f32.partialorder %v1829_v3, 0.0 }
  0x71   : >> { %v999_v6 = vadd.f32 %v998_v25, %v997_v61  ;;  %vm1006_vm6 = vweird.f32 %v1829_v3  ;;  %v948_v5 = vsel %vm947_vm1, 2139095040, %v1516_v10  ;;  %vm1022_vm3 = vcmp.ne.f32.partialorder %v1880_v49, %v1021_v60  ;;  %vm942_vm1 = vmand %vm935_vm12, %vm1961_vm14 }
  0x72   : >> { %1393 = vpow2.f32 %v910_v8  ;;  %v1027_v8 = vcvt.f32.s32 %v1026_v40  ;;  %v954_v44 = vsel %vm1961_vm14, %v953_v56, %v952_v11  ;;  %vm957_vm11 = vcmp.ne.f32.partialorder %v1798_v23, %v1798_v23 }
  0x73   : >> { %v1000_v41 = vmul.f32 %v1870_v46, %v999_v6  ;;  %vm1003_vm0 = vcmp.eq.f32.partialorder %v1829_v3, 1.0  ;;  %v950_v61 = vsel %vm949_vm2, 1065353216, %v948_v5  ;;  %v955_v6 = vsel %vm932_vm15, %v954_v44, %v952_v11  ;;  %vm2006_vm14 = vmor %vm957_vm11, %vm958_vm7 }
  0x74   : >> { %v1028_v57 = vand.u32 1, %v1027_v8  ;;  %vm1017_vm12 = vcmp.lt.f32.partialorder %v1880_v49, 0  ;;  %vm1034_vm2 = vcmp.eq.f32.partialorder %v1820_v47, 0  ;;  %v469_v60 = vmul.f32 %v857_v53, %v1794_v22 }
  0x75   : >> { %v1002_v25 = vadd.f32 %v1001_v9, %v1000_v41  ;;  %vm1037_vm7 = vcmp.gt.f32.partialorder %v1829_v3, 1065353216  ;;  %vm2524_vm15 = vcmp.eq.f32.partialorder %v1868_v43, 2139095040  ;;  %vm915_vm11 = vcmp.eq.f32.partialorder %v1859_v2, 1065353216 }
  0x76   : >> { %v525_v5 = vadd.f32 %v1491_v19, %v469_v60  ;;  %v1041_v19 = vsel %vm1017_vm12, 2139095040, %v1516_v10 }
  0x77   : >> { %v1007_v59 = vsel %vm1006_vm6, %v1829_v3, %v1002_v25 }
  0x78   : >> { %v1394_v26 = vpop.eup %1393  ;;  %v1008_v40 = vsel %vm1005_vm5, nan, %v1007_v59  ;;  %vm2523_vm5 = vcmp.eq.f32.partialorder %v1798_v23, 1065353216  ;;  %v521_v59 = vadd.f32 %v1847_v35, %v469_v60 }
  0x79   : >> { %v939_v46 = vsel %vm1951_vm9, 2143289344, %v1394_v26  ;;  %vm937_vm9 = vcmp.eq.f32.partialorder %v1823_v50, 2139095040  ;;  %v1009_v56 = vsel %vm1004_vm4, -inf, %v1008_v40  ;;  %vm961_vm6 = vmor %vm2523_vm5, %vm914_vm10  ;;  %vm1029_vm4 = vcmp.eq.s32.totalorder %v1028_v57, 1 }
  0x7a   : >> { %v941_v34 = vsel %vm933_vm13, %v940_v39, %v939_v46  ;;  %vm2000_vm13 = vmor %vm1022_vm3, %vm1014_vm8  ;;  %v1010_v11 = vsel %vm1003_vm0, 0.0, %v1009_v56  ;;  %vm1033_vm10 = vcmp.lt.f32.partialorder %v1820_v47, 0  ;;  %v1053_v50 = vsel %vm1017_vm12, 0, %v1515_v48 }
  0x7b   : >> { %v943_v1 = vxor.u32 2147483648, %v941_v34  ;;  %v1011_v41 = vmul.f32 %v1010_v11, %v1880_v49  ;;  %vm1030_vm3 = vmneg %vm2000_vm13  ;;  %v1054_v44 = vxor.u32 2147483648, %v1053_v50  ;;  %v527_v57 = vadd.f32 %v525_v5, %v1847_v35 }
  0x7c   : >> { %vm2035_vm0 = vmand %vm1017_vm12, %vm1034_vm2 }
  0x7d   : >> { %v944_v62 = vsel %vm942_vm1, %v943_v1, %v941_v34  ;;  %1395 = vpow2.f32 %v1011_v41  ;;  %vm2043_vm1 = vmxor %vm1017_vm12, %vm1037_vm7  ;;  %vm463_vm7 = vcmp.ge.f32.partialorder %v1791_v16, %v1667_v55 }
  0x7e   : >> { %v951_v39 = vsel %vm2524_vm15, %v950_v61, %v944_v62  ;;  %vm1031_vm5 = vmand %vm1029_vm4, %vm1030_vm3  ;;  %vm1036_vm4 = vcmp.lt.s32.totalorder %v1820_v47, 0  ;;  %v858_v40 = vsel %vm463_vm7, 1.0, %v2514_v51  ;;  %vm1015_vm3 = vcmp.eq.f32.partialorder %v1880_v49, 0 }
  0x7f   : >> { %v956_v53 = vsel %vm937_vm9, %v955_v6, %v951_v39  ;;  %vm1024_vm9 = vcmp.lt.f32.partialorder %v1898_v36, 1266679808  ;;  %v470_v62 = vmul.f32 %v858_v40, %v1794_v22 }
  0x80   : >> { %v960_v8 = vsel %vm2006_vm14, 2143289344, %v956_v53  ;;  %vm2057_vm14 = vmand %vm1033_vm10, %vm2000_vm13  ;;  %vm1050_vm13 = vcmp.eq.f32.partialorder %v1820_v47, 3212836864 }
  0x81   : >> { %v962_v26 = vsel %vm961_vm6, 1065353216, %v960_v8  ;;  %vm1048_vm6 = vmor %vm2035_vm0, %vm2043_vm1  ;;  %vm1059_vm0 = vcmp.ne.f32.partialorder %v1880_v49, %v1880_v49  ;;  %vm1035_vm1 = vcmp.eq.f32.partialorder %v1820_v47, 1065353216  ;;  %v526_v2 = vadd.f32 %v1487_v20, %v470_v62 }
  0x82   : >> { %v963_v25 = vsel %vm915_vm11, %v1798_v23, %v962_v26  ;;  %vm1032_vm15 = vmand %vm1024_vm9, %vm1031_vm5  ;;  %v1049_v61 = vsel %vm1048_vm6, 2139095040, %v1516_v10  ;;  %vm1058_vm11 = vcmp.ne.f32.partialorder %v1820_v47, %v1820_v47  ;;  %vm1038_vm9 = vcmp.eq.f32.partialorder %v1829_v3, 2139095040 }
  0x83   : >> { %v517_v34 = vmax.f32 %v963_v25, 0.0  ;;  %v1396_v1 = vpop.eup %1395  ;;  %v1055_v7 = vsel %vm1032_vm15, %v1054_v44, %v1053_v50  ;;  %vm1043_vm12 = vmand %vm1036_vm4, %vm1032_vm15  ;;  %v1051_v51 = vsel %vm1050_vm13, 1065353216, %v1049_v61  ;;  %v522_v36 = vadd.f32 %v1849_v4, %v470_v62 }
  0x84   : >> { %v1040_v16 = vsel %vm2057_vm14, 2143289344, %v1396_v1  ;;  %v1056_v60 = vsel %vm1033_vm10, %v1055_v7, %v1053_v50  ;;  %vm1062_vm5 = vmor %vm1035_vm1, %vm1015_vm3  ;;  %vm1016_vm14 = vcmp.eq.f32.partialorder %v1880_v49, 1065353216  ;;  %v528_v25 = vadd.f32 %v526_v2, %v1849_v4 }
  0x85   : >> { %v519_v23 = vmin.f32 %v517_v34, 1.0  ;;  %v1042_v9 = vsel %vm1034_vm2, %v1041_v19, %v1040_v16  ;;  %vm1060_vm2 = vmor %vm1058_vm11, %vm1059_vm0 }
  0x86   : >> { %v1044_v35 = vxor.u32 2147483648, %v1042_v9 }
  0x87   : >> { %v2078_v6 = vmul.f32 %v521_v59, %v519_v23 }
  0x88   : >> { %v1045_v11 = vsel %vm1043_vm12, %v1044_v35, %v1042_v9  ;;  %v451_v35 = vld [vmem:[%s1842_s12 + $0x10] sm:$0xff] }
  0x89   : >> { %v529_v56 = vsub.f32 %v527_v57, %v2078_v6  ;;  %v1052_v41 = vsel %vm1014_vm8, %v1051_v51, %v1045_v11  ;;  %v457_v11 = vmul.f32 4.7, %v451_v35 }
  0x8a   : >> { %v1057_v53 = vsel %vm1038_vm9, %v1056_v60, %v1052_v41 }
  0x8b   : >> { %v531_v39 = vsub.f32 %v529_v56, %v1591_v13  ;;  %v1061_v3 = vsel %vm1060_vm2, 2143289344, %v1057_v53 }
  0x8c   : >> { %v1063_v8 = vsel %vm1062_vm5, 1065353216, %v1061_v3 }
  0x8d   : >> { %v2099_v43 = vmax.f32 %v531_v39, 0.0  ;;  %v1064_v50 = vsel %vm1016_vm14, %v1820_v47, %v1063_v8 }
  0x8e   : >> { %v518_v26 = vmax.f32 %v1064_v50, 0.0 }
  0x8f   : >> { %v2103_v22 = vsub.f32 %v529_v56, %v2099_v43 }
  0x90   : >> { %v520_v49 = vmin.f32 %v518_v26, 1.0  ;;  %v2136_v26 = vadd.f32 0.3, %v457_v11 }
  0x91   : >> { %v2109_v5 = vmul.f32 %v2103_v22, %v1733_v52 }
  0x92   : >> { %v2115_v44 = vmul.f32 %v522_v36, %v520_v49  ;;  %v1121_v11 = vfloor.f32 %v2136_v26  ;;  %vm1119_vm6 = vcmp.lt.s32.totalorder %v2136_v26, 0  ;;  %vm1118_vm11 = vcmp.lt.f32.partialorder %v2136_v26, 0 }
  0x93   : >> { %v2113_v46 = vand.u32 2147483647, %v2109_v5  ;;  %vm1135_vm1 = vcmp.eq.f32.partialorder %v2109_v5, 0  ;;  %vm1134_vm14 = vcmp.lt.f32.partialorder %v2109_v5, 0 }
  0x94   : >> { %v530_v47 = vsub.f32 %v528_v25, %v2115_v44 }
  0x95   : >> { %v1073_v20 = vand.u32 8388607, %v2113_v46  ;;  %v1069_v7 = vand.u32 2139095040, %v2113_v46  ;;  %vm1106_vm7 = vcmp.lt.f32.partialorder %v2113_v46, 0.0  ;;  %vm1107_vm15 = vweird.f32 %v2113_v46 }
  0x96   : >> { %v532_v59 = vsub.f32 %v530_v47, %v1593_v14  ;;  %vm1104_vm3 = vcmp.eq.f32.partialorder %v2113_v46, 1.0  ;;  %vm1105_vm12 = vcmp.eq.f32.partialorder %v2113_v46, 0.0  ;;  %vm1138_vm9 = vcmp.gt.f32.partialorder %v2113_v46, 1065353216 }
  0x97   : >> { %v1074_v34 = vor.u32 8388608, %v1073_v20  ;;  %v1070_v60 = vshrl.u32 %v1069_v7, 23 }
  0x98   : >> { %v2120_v23 = vmax.f32 %v532_v59, 0.0 }
  0x99   : >> { %v1076_v19 = vand.u32 8388607, %v1074_v34  ;;  %v1166_v2 = vadd.s32 4294967169, %v1070_v60  ;;  %v1120_v60 = vceil.f32 %v2136_v26 }
  0x9a   : >> { %v2123_v1 = vsub.f32 %v530_v47, %v2120_v23 }
  0x9b   : >> { %v1077_v57 = vor.u32 1065353216, %v1076_v19  ;;  %v1081_v34 = vadd.s32 1, %v1166_v2 }
  0x9c   : >> { %v2128_v16 = vmul.f32 %v2123_v1, %v1735_v12 }
  0x9d   : >> { %vm1078_vm8 = vcmp.ge.f32.partialorder %v1077_v57, 1.4142135  ;;  %v1079_v4 = vmul.f32 0.5, %v1077_v57 }
  0x9e   : >> { %v2133_v62 = vand.u32 2147483647, %v2128_v16 }
  0x9f   : >> { %v1080_v61 = vsel %vm1078_vm8, %v1079_v4, %v1077_v57 }
  0xa0   : >> { %v1167_v40 = vadd.f32 -1.0, %v1080_v61  ;;  %v1174_v53 = vand.u32 8388607, %v2133_v62  ;;  %v2141_v61 = vand.u32 2147483647, %v2136_v26 }
  0xa2   : >> { %v1084_v9 = vmul.f32 %v1167_v40, %v1167_v40  ;;  %v1175_v50 = vor.u32 8388608, %v1174_v53  ;;  %vm1115_vm4 = vcmp.eq.f32.partialorder %v2141_v61, 2139095040 }
  0xa4   : >> { %v1085_v51 = vmul.f32 0.12621109, %v1084_v9  ;;  %v1087_v56 = vmul.f32 -0.20706727, %v1084_v9  ;;  %v1177_v25 = vand.u32 8388607, %v1175_v50 }
  0xa6   : >> { %v1086_v39 = vadd.f32 0.21545328, %v1085_v51  ;;  %v1088_v41 = vadd.f32 -0.23896284, %v1087_v56  ;;  %v2138_v59 = vor.u32 1065353216, %v1177_v25  ;;  %v1082_v56 = vsel %vm1078_vm8, %v1081_v34, %v1166_v2  ;;  %vm2185_vm8 = vmand %vm1118_vm11, %vm1135_vm1 }
  0xa7   : >> { %v1102_v2 = vcvt.s32.f32 %v1082_v56 }
  0xa8   : >> { %v1089_v3 = vmul.f32 %v1086_v39, %v1084_v9  ;;  %v1091_v8 = vmul.f32 %v1088_v41, %v1084_v9  ;;  %vm1179_vm10 = vcmp.ge.f32.partialorder %v2138_v59, 1.4142135  ;;  %v1180_v7 = vmul.f32 0.5, %v2138_v59  ;;  %v452_v41 = vld [vmem:[%s1842_s12 + $0x18] sm:$0xff] }
  0xaa   : >> { %v1090_v36 = vadd.f32 0.28795174, %v1089_v3  ;;  %v1092_v49 = vadd.f32 -0.3607037, %v1091_v8  ;;  %v1181_v39 = vsel %vm1179_vm10, %v1180_v7, %v2138_v59  ;;  %v1127_v3 = vfloor.f32 %v2141_v61 }
  0xab   : >> { %v2154_v8 = vadd.f32 -1.0, %v1181_v39  ;;  %v1142_v59 = vsel %vm1118_vm11, 2139095040, %v1516_v10 }
  0xac   : >> { %v1093_v20 = vmul.f32 %v1090_v36, %v1084_v9  ;;  %v1095_v47 = vmul.f32 %v1092_v49, %v1084_v9  ;;  %v458_v36 = vmul.f32 4.7, %v452_v41  ;;  %v1122_v49 = vsel %vm1119_vm6, %v1120_v60, %v1121_v11  ;;  %vm2197_vm6 = vmxor %vm1118_vm11, %vm1138_vm9 }
  0xad   : >> { %v1185_v50 = vmul.f32 %v2154_v8, %v2154_v8  ;;  %vm1123_vm13 = vcmp.ne.f32.partialorder %v2136_v26, %v1122_v49 }
  0xae   : >> { %v1094_v19 = vadd.f32 0.48090908, %v1093_v20  ;;  %v1096_v4 = vadd.f32 -0.72134733, %v1095_v47  ;;  %v1128_v20 = vcvt.f32.s32 %v1127_v3  ;;  %v2166_v11 = vadd.f32 0.3, %v458_v36  ;;  %vm2171_vm0 = vmor %vm1123_vm13, %vm1115_vm4 }
  0xaf   : >> { %v1186_v47 = vmul.f32 0.12621109, %v1185_v50  ;;  %v1188_v34 = vmul.f32 -0.20706727, %v1185_v50  ;;  %vm1131_vm5 = vmneg %vm2171_vm0 }
  0xb0   : >> { %v1097_v35 = vmul.f32 %v1094_v19, %v1084_v9  ;;  %v1099_v51 = vmul.f32 %v1167_v40, %v1096_v4  ;;  %v1170_v9 = vand.u32 2139095040, %v2133_v62  ;;  %vm2206_vm13 = vmand %vm1134_vm14, %vm2171_vm0  ;;  %v1221_v41 = vceil.f32 %v2166_v11 }
  0xb1   : >> { %v1187_v7 = vadd.f32 0.21545328, %v1186_v47  ;;  %v1154_v47 = vsel %vm1118_vm11, 0, %v1515_v48  ;;  %vm1220_vm9 = vcmp.lt.s32.totalorder %v2166_v11, 0 }
  0xb2   : >> { %v1098_v53 = vadd.f32 1.442695, %v1097_v35  ;;  %v1171_v19 = vshrl.u32 %v1170_v9, 23  ;;  %v1189_v35 = vadd.f32 -0.23896284, %v1188_v34 }
  0xb3   : >> { %v1190_v56 = vmul.f32 %v1187_v7, %v1185_v50 }
  0xb4   : >> { %v1100_v57 = vadd.f32 %v1099_v51, %v1098_v53  ;;  %v1129_v51 = vand.u32 1, %v1128_v20  ;;  %v1192_v60 = vmul.f32 %v1189_v35, %v1185_v50  ;;  %v1267_v53 = vadd.s32 4294967169, %v1171_v19 }
  0xb5   : >> { %v1191_v9 = vadd.f32 0.28795174, %v1190_v56  ;;  %v2193_v19 = vand.u32 2147483647, %v2166_v11 }
  0xb6   : >> { %v1101_v25 = vmul.f32 %v1167_v40, %v1100_v57  ;;  %v1193_v57 = vadd.f32 -0.3607037, %v1192_v60  ;;  %vm1130_vm2 = vcmp.eq.s32.totalorder %v1129_v51, 1  ;;  %v1182_v34 = vadd.s32 1, %v1267_v53 }
  0xb7   : >> { %v1194_v49 = vmul.f32 %v1191_v9, %v1185_v50  ;;  %v1155_v51 = vxor.u32 2147483648, %v1154_v47  ;;  %v1228_v9 = vfloor.f32 %v2193_v19 }
  0xb8   : >> { %v1103_v4 = vadd.f32 %v1102_v2, %v1101_v25  ;;  %v1196_v25 = vmul.f32 %v1193_v57, %v1185_v50 }
  0xb9   : >> { %v1195_v7 = vadd.f32 0.48090908, %v1194_v49 }
  0xba   : >> { %v1108_v40 = vsel %vm1107_vm15, %v2113_v46, %v1103_v4  ;;  %v1197_v35 = vadd.f32 -0.72134733, %v1196_v25  ;;  %vm1132_vm15 = vmand %vm1130_vm2, %vm1131_vm5  ;;  %vm1136_vm2 = vcmp.eq.f32.partialorder %v2109_v5, 1065353216  ;;  %vm1137_vm5 = vcmp.lt.s32.totalorder %v2109_v5, 0 }
  0xbb   : >> { %v1109_v39 = vsel %vm1106_vm7, nan, %v1108_v40  ;;  %vm1125_vm7 = vcmp.lt.f32.partialorder %v2141_v61, 1266679808  ;;  %v1198_v56 = vmul.f32 %v1195_v7, %v1185_v50  ;;  %v1229_v4 = vcvt.f32.s32 %v1228_v9 }
  0xbc   : >> { %v1110_v3 = vsel %vm1105_vm12, -inf, %v1109_v39  ;;  %v1200_v60 = vmul.f32 %v2154_v8, %v1197_v35  ;;  %v1183_v39 = vsel %vm1179_vm10, %v1182_v34, %v1267_v53  ;;  %vm1116_vm12 = vcmp.eq.f32.partialorder %v2136_v26, 0  ;;  %vm2221_vm0 = vmand %vm1125_vm7, %vm1132_vm15 }
  0xbd   : >> { %v1111_v2 = vsel %vm1104_vm3, 0.0, %v1110_v3  ;;  %vm1149_vm3 = vmor %vm2185_vm8, %vm2197_vm6  ;;  %v1222_v3 = vfloor.f32 %v2166_v11  ;;  %v1199_v57 = vadd.f32 1.442695, %v1198_v56  ;;  %vm1139_vm10 = vcmp.eq.f32.partialorder %v2113_v46, 2139095040 }
  0xbe   : >> { %v1112_v36 = vmul.f32 %v1111_v2, %v2136_v26  ;;  %v1150_v2 = vsel %vm1149_vm3, 2139095040, %v1516_v10  ;;  %vm1151_vm8 = vcmp.eq.f32.partialorder %v2109_v5, 3212836864  ;;  %v1203_v49 = vcvt.s32.f32 %v1183_v39  ;;  %vm1144_vm11 = vmand %vm1137_vm5, %vm2221_vm0 }
  0xbf   : >> { %v1156_v20 = vsel %vm2221_vm0, %v1155_v51, %v1154_v47  ;;  %v1223_v34 = vsel %vm1220_vm9, %v1221_v41, %v1222_v3  ;;  %vm1159_vm6 = vcmp.ne.f32.partialorder %v2109_v5, %v2109_v5  ;;  %vm1160_vm7 = vcmp.ne.f32.partialorder %v2136_v26, %v2136_v26 }
  0xc0   : >> { %1397 = vpow2.f32 %v1112_v36  ;;  %v1201_v36 = vadd.f32 %v1200_v60, %v1199_v57  ;;  %v1152_v56 = vsel %vm1151_vm8, 1065353216, %v1150_v2  ;;  %vm1207_vm15 = vcmp.lt.f32.partialorder %v2133_v62, 0.0  ;;  %vm2253_vm0 = vmor %vm1159_vm6, %vm1160_vm7 }
  0xc1   : >> { %v1157_v51 = vsel %vm1134_vm14, %v1156_v20, %v1154_v47  ;;  %vm1224_vm3 = vcmp.ne.f32.partialorder %v2166_v11, %v1223_v34  ;;  %vm1206_vm9 = vcmp.eq.f32.partialorder %v2133_v62, 0.0  ;;  %vm1117_vm5 = vcmp.eq.f32.partialorder %v2136_v26, 1065353216  ;;  %vm1163_vm14 = vmor %vm1136_vm2, %vm1116_vm12 }
  0xc2   : >> { %v1202_v35 = vmul.f32 %v2154_v8, %v1201_v36  ;;  %v1230_v8 = vand.u32 1, %v1229_v4  ;;  %vm1205_vm8 = vcmp.eq.f32.partialorder %v2133_v62, 1.0  ;;  %vm1236_vm12 = vcmp.eq.f32.partialorder %v2128_v16, 0 }
  0xc3   : >> { %v574_v46 = vadd.f32 %v1483_v24, %v2078_v6  ;;  %vm1235_vm7 = vcmp.lt.f32.partialorder %v2128_v16, 0 }
  0xc4   : >> { %v1204_v60 = vadd.f32 %v1203_v49, %v1202_v35  ;;  %vm2285_vm2 = vcmp.eq.s32.totalorder %v1230_v8, 1 }
  0xc5   : >> { %v576_v24 = vadd.f32 %v574_v46, %v2099_v43 }
  0xc6   : >> { %v1398_v53 = vpop.eup %1397 }
  0xc7   : >> { %v1141_v25 = vsel %vm2206_vm13, 2143289344, %v1398_v53  ;;  %vm1208_vm13 = vweird.f32 %v2133_v62  ;;  %v575_v53 = vadd.f32 %v1479_v27, %v2115_v44  ;;  %v545_v44 = vperm.slane %v1788_v63, 2 }
  0xc8   : >> { %v1143_v7 = vsel %vm1135_vm1, %v1142_v59, %v1141_v25  ;;  %vm1216_vm1 = vcmp.eq.f32.partialorder %v2193_v19, 2139095040  ;;  %v1209_v47 = vsel %vm1208_vm13, %v2133_v62, %v1204_v60  ;;  %v2318_v26 = vmin.f32 %v576_v24, %v1624_v32 }
  0xc9   : >> { %v1145_v40 = vxor.u32 2147483648, %v1143_v7  ;;  %v1210_v50 = vsel %vm1207_vm15, nan, %v1209_v47  ;;  %v577_v27 = vadd.f32 %v575_v53, %v2120_v23 }
  0xca   : >> { %v1211_v59 = vsel %vm1206_vm9, -inf, %v1210_v50 }
  0xcb   : >> { %v1146_v39 = vsel %vm1144_vm11, %v1145_v40, %v1143_v7  ;;  %vm1219_vm11 = vcmp.lt.f32.partialorder %v2166_v11, 0  ;;  %v1212_v36 = vsel %vm1205_vm8, 0.0, %v1211_v59  ;;  %v2321_v34 = vmin.f32 %v577_v27, %v1626_v33 }
  0xcc   : >> { %v1153_v3 = vsel %vm1115_vm4, %v1152_v56, %v1146_v39  ;;  %vm2274_vm4 = vmor %vm1224_vm3, %vm1216_vm1  ;;  %v1213_v20 = vmul.f32 %v1212_v36, %v2166_v11  ;;  %v1255_v23 = vsel %vm1219_vm11, 0, %v1515_v48  ;;  %vm1226_vm3 = vcmp.lt.f32.partialorder %v2193_v19, 1266679808 }
  0xcd   : >> { %v1158_v9 = vsel %vm1139_vm10, %v1157_v51, %v1153_v3  ;;  %vm1239_vm10 = vcmp.gt.f32.partialorder %v2133_v62, 1065353216  ;;  %vm1232_vm6 = vmneg %vm2274_vm4  ;;  %v580_v48 = vsub.f32 %v576_v24, %v2318_v26  ;;  %v581_v35 = vsub.f32 %v577_v27, %v2321_v34 }
  0xce   : >> { %v1162_v57 = vsel %vm2253_vm0, 2143289344, %v1158_v9  ;;  %vm2303_vm15 = vmand %vm1219_vm11, %vm1236_vm12  ;;  %1399 = vpow2.f32 %v1213_v20  ;;  %v1256_v40 = vxor.u32 2147483648, %v1255_v23  ;;  %vm1217_vm8 = vcmp.eq.f32.partialorder %v2166_v11, 0 }
  0xcf   : >> { %v1164_v2 = vsel %vm1163_vm14, 1065353216, %v1162_v57  ;;  %vm2310_vm13 = vmxor %vm1219_vm11, %vm1239_vm10  ;;  %v582_v60 = vsub.f32 %v580_v48, %v1634_v37  ;;  %v583_v39 = vsub.f32 %v581_v35, %v1636_v38  ;;  %v1243_v41 = vsel %vm1219_vm11, 2139095040, %v1516_v10 }
  0xd0   : >> { %v1165_v25 = vsel %vm1117_vm5, %v2109_v5, %v1164_v2  ;;  %vm1233_vm0 = vmand %vm2285_vm2, %vm1232_vm6  ;;  %vm1252_vm2 = vcmp.eq.f32.partialorder %v2128_v16, 3212836864  ;;  %vm1260_vm10 = vcmp.ne.f32.partialorder %v2128_v16, %v2128_v16  ;;  %vm1261_vm6 = vcmp.ne.f32.partialorder %v2166_v11, %v2166_v11 }
  0xd1   : >> { %v541_v5 = vmax.f32 %v1165_v25, 0.0  ;;  %vm2330_vm9 = vmand %vm1235_vm7, %vm2274_vm4  ;;  %vm1238_vm4 = vcmp.lt.s32.totalorder %v2128_v16, 0  ;;  %v584_v9 = vmax.f32 %v582_v60, 0.0  ;;  %v585_v50 = vmax.f32 %v583_v39, 0.0 }
  0xd2   : >> { %vm1250_vm5 = vmor %vm2303_vm15, %vm2310_vm13  ;;  %vm1237_vm15 = vcmp.eq.f32.partialorder %v2128_v16, 1065353216  ;;  %vm1240_vm13 = vcmp.eq.f32.partialorder %v2133_v62, 2139095040 }
  0xd3   : >> { %v543_v4 = vmin.f32 %v541_v5, 1.0  ;;  %vm2342_vm14 = vmand %vm1226_vm3, %vm1233_vm0  ;;  %v1251_v47 = vsel %vm1250_vm5, 2139095040, %v1516_v10  ;;  %v586_v10 = vmul.f32 %v584_v9, %v1595_v15  ;;  %v587_v53 = vmul.f32 %v585_v50, %v1597_v17 }
  0xd4   : >> { %v1400_v3 = vpop.eup %1399  ;;  %v1257_v57 = vsel %vm2342_vm14, %v1256_v40, %v1255_v23  ;;  %vm1245_vm11 = vmand %vm1238_vm4, %vm2342_vm14  ;;  %v1253_v36 = vsel %vm1252_vm2, 1065353216, %v1251_v47  ;;  %vm646_vm0 = vcmask 1041408   ;;  %vm650_vm5 = vcmask 1043456  }
  0xd5   : >> { %v546_v56 = vmul.f32 %v545_v44, %v543_v4  ;;  %v1242_v61 = vsel %vm2330_vm9, 2143289344, %v1400_v3  ;;  %v588_v25 = vsub.f32 %v580_v48, %v586_v10  ;;  %v589_v20 = vsub.f32 %v581_v35, %v587_v53  ;;  %vm1264_vm3 = vmor %vm1237_vm15, %vm1217_vm8 }
  0xd6   : >> { %v1244_v46 = vsel %vm1236_vm12, %v1243_v41, %v1242_v61  ;;  %vm1262_vm12 = vmor %vm1260_vm10, %vm1261_vm6  ;;  %vm648_vm9 = vcmask 1042432  }
  0xd7   : >> { %v548_v8 = vmin.f32 %v2103_v22, %v546_v56  ;;  %v1246_v2 = vxor.u32 2147483648, %v1244_v46  ;;  %v590_v62 = vmul.f32 %v588_v25, %v1599_v18  ;;  %v591_v5 = vmul.f32 %v589_v20, %v1607_v21 }
  0xd9   : >> { %v550_v59 = vsub.f32 %v2103_v22, %v548_v8  ;;  %v1258_v22 = vsel %vm1235_vm7, %v1257_v57, %v1255_v23  ;;  %v1247_v24 = vsel %vm1245_vm11, %v1246_v2, %v1244_v46  ;;  %vm1218_vm7 = vcmp.eq.f32.partialorder %v2166_v11, 1065353216 }
  0xda   : >> { %v1254_v6 = vsel %vm1216_vm1, %v1253_v36, %v1247_v24  ;;  %v554_v23 = vmul.f32 %v1475_v30, %v1675_v58  ;;  %v2388_v24 = vsub.f32 %v588_v25, %v590_v62   ;;  %v620_v25 = vadd.f32 %v591_v5, %v590_v62 }
  0xdb   : >> { %v552_v49 = vmax.f32 %v550_v59, 1e-05  ;;  %v1259_v43 = vsel %vm1240_vm13, %v1258_v22, %v1254_v6  ;;  %v612_v22 = vadd.f32 %v587_v53, %v586_v10  ;;  %vm644_vm1 = vcmask 1040384  }
  0xdc   : >> { %v1263_v7 = vsel %vm1262_vm12, 2143289344, %v1259_v43  ;;  %v2555_v48 = vmov %v2388_v24 }
  0xdd   : >> { %v556_v27 = vmul.f32 %v552_v49, %v1721_v42  ;;  %v1265_v19 = vsel %vm1264_vm3, 1065353216, %v1263_v7  ;;  %661 = vst [vmem:[#allocation5] sm:$0xff] (%p430_p6), %v2555_v48 }
  0xde   : >> { %v1266_v56 = vsel %vm1218_vm7, %v2128_v16, %v1265_v19 }
  0xdf   : >> { %v558_v4 = vmin.f32 %v556_v27, 1.0  ;;  %v2390_v27 = vsub.f32 %v589_v20, %v591_v5   ;;  %v542_v51 = vmax.f32 %v1266_v56, 0.0 }
  0xe1   : >> { %v2556_v35 = vmov %v2390_v27  ;;  %v560_v40 = vsub.f32 1.0, %v558_v4  ;;  %v544_v39 = vmin.f32 %v542_v51, 1.0  ;;  %v613_v27 = vrot.slane %v612_v22, 4 }
  0xe2   : >> { %v600_v4 = vadd.f32 %v590_v62, %v586_v10  ;;  %v601_v51 = vadd.f32 %v591_v5, %v587_v53  ;;  %662 = vst [vmem:[#allocation5 + $0x8] sm:$0xff] (%p430_p6), %v2556_v35 }
  0xe3   : >> { %v562_v60 = vmul.f32 %v560_v40, %v554_v23  ;;  %v547_v11 = vmul.f32 %v545_v44, %v544_v39  ;;  %v555_v44 = vmul.f32 %v1471_v31, %v1688_v0 }
  0xe5   : >> { %v564_v41 = vmin.f32 %v1475_v30, %v562_v60  ;;  %v549_v9 = vmin.f32 %v2123_v1, %v547_v11 }
  0xe7   : >> { %v2396_v19 = vadd.f32 %v564_v41, %v552_v49  ;;  %v570_v47 = vsub.f32 %v1475_v30, %v564_v41  ;;  %v551_v57 = vsub.f32 %v2123_v1, %v549_v9  ;;  %v636_v24 = vadd.f32 %v549_v9, %v548_v8 }
  0xe9   : >> { %v2557_v3 = vmov %v2396_v19  ;;  %v572_v61 = vmax.f32 %v570_v47, 1e-05  ;;  %v553_v59 = vmax.f32 %v551_v57, 1e-05  ;;  %v637_v23 = vrot.slane %v636_v24, 4 }
  0xea   : >> { %v568_v50 = vmax.f32 %v2557_v3, 1e-05   ;;  %v614_v19 = vadd.f32 %v613_v27, %v612_v22 }
  0xeb   : >> { %v594_v16 = vadd.f32 %v2318_v26, %v572_v61  ;;  %v557_v2 = vmul.f32 %v553_v59, %v1724_v45  ;;  %v621_v26 = vrot.slane %v620_v25, 4  ;;  %v638_v60 = vadd.f32 %v637_v23, %v636_v24 }
  0xec   : >> { %v615_v41 = vrot.slane %v614_v19, 2  ;;  %659 = vst [vmem:[#allocation4 + $0x8] sm:$0xff] (%p430_p6), %v568_v50 }
  0xed   : >> { %v596_v46 = vmul.f32 %v594_v16, %v1620_v28  ;;  %v559_v36 = vmin.f32 %v557_v2, 1.0  ;;  %v622_v40 = vadd.f32 %v621_v26, %v620_v25  ;;  %v639_v57 = vrot.slane %v638_v60, 2 }
  0xef   : >> { %v2405_v30 = vsub.f32 %v594_v16, %v596_v46   ;;  %v561_v49 = vsub.f32 1.0, %v559_v36  ;;  %v602_v39 = vadd.f32 %v600_v4, %v596_v46  ;;  %v623_v11 = vrot.slane %v622_v40, 2 }
  0xf0   : >> { %v640_v36 = vadd.f32 %v639_v57, %v638_v60  ;;  %v2574_v57 = vld [vmem:[#allocation16_spill] sm:$0xff] (%p430_p6) }
  0xf1   : >> { %v2558_v63 = vmov %v2405_v30  ;;  %v563_v20 = vmul.f32 %v561_v49, %v555_v44  ;;  %v624_v10 = vadd.f32 %v623_v11, %v622_v40  ;;  %v2572_v11 = vld [vmem:[#allocation14_spill] sm:$0xff] (%p430_p6)  ;;  %658 = vst [vmem:[#allocation3] sm:$0xff] (%p430_p6), %v2574_v57 }
  0xf2   : > { %656 = vst [vmem:[#allocation2 + $0x8] sm:$0xff] (%p430_p6), %v2572_v11 }
  0xf3   : >> { %v565_v1 = vmin.f32 %v1471_v31, %v563_v20  ;;  %v625_v49 = vrot.slane %v624_v10, 1  ;;  %663 = vst [vmem:[#allocation6] sm:$0xff] (%p430_p6), %v2558_v63 }
  0xf5   : >> { %v2410_v20 = vadd.f32 %v565_v1, %v553_v59  ;;  %v571_v43 = vsub.f32 %v1471_v31, %v565_v1  ;;  %v616_v59 = vadd.f32 %v615_v41, %v614_v19  ;;  %v2571_v41 = vld [vmem:[#allocation13_spill] sm:$0xff] (%p430_p6) }
  0xf6   : > { %655 = vst [vmem:[#allocation2] sm:$0xff] (%p430_p6), %v2571_v41 }
  0xf7   : >> { %v2559_v6 = vmov %v2410_v20  ;;  %v573_v30 = vmax.f32 %v571_v43, 1e-05  ;;  %v617_v53 = vrot.slane %v616_v59, 1  ;;  %v641_v20 = vrot.slane %v640_v36, 1 }
  0xf8   : >> { %v569_v7 = vmax.f32 %v2559_v6, 1e-05  }
  0xf9   : >> { %v595_v56 = vadd.f32 %v2321_v34, %v573_v30  ;;  %v642_v43 = vadd.f32 %v641_v20, %v640_v36 }
  0xfa   : >> { %v2565_v20 = vmov %v569_v7  ;;  %660 = vst [vmem:[#allocation4] sm:$0xff] (%p430_p6), %v569_v7 }
  0xfb   : >> { %v597_v8 = vmul.f32 %v595_v56, %v1622_v29 }
  0xfd   : >> { %v2416_v31 = vsub.f32 %v595_v56, %v597_v8   ;;  %v603_v9 = vadd.f32 %v601_v51, %v597_v8  ;;  %v628_v61 = vadd.f32 %v597_v8, %v596_v46  ;;  %v626_v46 = vadd.f32 %v625_v49, %v624_v10  ;;  %v2567_v10 = vld [vmem:[#allocation16_spill] sm:$0xff] }
  0xfe   : >> { %v643_v56 = vmul.f32 0.0625, %v642_v43 }
  0xff   : >> { %v2560_v47 = vmov %v2416_v31  ;;  %v604_v16 = vadd.f32 %v603_v9, %v602_v39  ;;  %v629_v2 = vrot.slane %v628_v61, 4  ;;  %v618_v31 = vadd.f32 %v617_v53, %v616_v59  ;;  %v2568_v9 = vld [vmem:[#allocation15_spill] sm:$0xff] }
 0x100   : >> { %v627_v4 = vmul.f32 0.0625, %v626_v46  ;;  %664 = vst [vmem:[#allocation6 + $0x8] sm:$0xff] (%p430_p6), %v2560_v47 }
 0x101   : >> { %v605_v62 = vrot.slane %v604_v16, 4  ;;  %v630_v44 = vadd.f32 %v629_v2, %v628_v61  ;;  %v619_v30 = vmul.f32 0.0625, %v618_v31  ;;  %v2561_v31 = vmov %v2560_v47  ;;  %v2573_v61 = vld [vmem:[#allocation15_spill] sm:$0xff] (%p430_p6) }
 0x102   : > { %657 = vst [vmem:[#allocation3 + $0x8] sm:$0xff] (%p430_p6), %v2573_v61 }
 0x103   : >> { %v606_v34 = vadd.f32 %v605_v62, %v604_v16  ;;  %v631_v5 = vrot.slane %v630_v44, 2 }
 0x105   : >> { %v607_v22 = vrot.slane %v606_v34, 2  ;;  %v632_v25 = vadd.f32 %v631_v5, %v630_v44  ;;  %v2569_v5 = vld [vmem:[#allocation14_spill] sm:$0xff] }
 0x107   : >> { %v608_v24 = vadd.f32 %v607_v22, %v606_v34  ;;  %v633_v1 = vrot.slane %v632_v25, 1 }
 0x109   : >> { %v609_v27 = vrot.slane %v608_v24, 1  ;;  %v634_v26 = vadd.f32 %v633_v1, %v632_v25 }
 0x10b   : >> { %v610_v23 = vadd.f32 %v609_v27, %v608_v24  ;;  %v635_v40 = vmul.f32 0.0625, %v634_v26  ;;  %v2563_v27 = vmov %v2556_v35  ;;  %v2564_v24 = vmov %v2555_v48 }
 0x10d   : >> { %v611_v19 = vmul.f32 0.0625, %v610_v23 }
 0x10f   : >> { %v645_v51 = vsel %vm644_vm1, %v611_v19, %v619_v30  ;;  %v2562_v30 = vmov %v2558_v63  ;;  %v2566_v19 = vmov %v568_v50  ;;  %432 = sbr.rel (!%p430_p6) target bundleno = 64 (0x40), region = 94 }
 0x110   : >> { %v647_v60 = vsel %vm646_vm0, %v645_v51, %v627_v4  ;;  %v2570_v4 = vld [vmem:[#allocation13_spill] sm:$0xff] }
 0x111   : >> { %v649_v8 = vsel %vm648_vm9, %v647_v60, %v635_v40 }
 0x112   : >> { %v651_v39 = vsel %vm650_vm5, %v649_v8, %v643_v56 }
 0x113   : >> { %654 = vst [vmem:[%s653_s17] sm:$0x1f] %v651_v39 }
 0x114 PF: > { %s13_s14 = sadd.s32 1, %s1467_s14   ;;  %s2575_s12 = smov %s1463_s13 }
 0x115   : > { %p10_p7 = scmp.ge.s32.totalorder %s13_s14, 4   ;;  %s2576_s13 = smov %s2578_s15 }
 0x117   :  { %12 = sbr.rel (!%p10_p7) target bundleno = 2 (0x2), region = 105 }

</bundles_post_ra>
